<compile_context>
chip_gen: v6e
topology: v6e:2x2x1
jax: 0.10.0
libtpu: 0.0.40
codegen_flags: <defaults>
</compile_context>

<pallas_src>
import jax
import jax.numpy as jnp
from jax.experimental import pallas as pl
from jax.experimental.pallas import tpu as pltpu


def resblock_kernel(xm_ref, xt_ref, xb_ref, w1_ref, b1_ref, w2_ref, b2_ref,
                    out_ref, slab_ref):
    # xm_ref:   (1, TH, W, Cin)  main row-tile of x (bf16), pre-ReLU (residual path)
    # xt_ref:   (1, 1,  W, Cin)  halo row above the tile (clamped index map)
    # xb_ref:   (1, 1,  W, Cin)  halo row below the tile (clamped index map)
    # w1_ref:   (9, Cin, Cmid)   3x3 conv weights, tap-major (ky*3+kx)
    # b1_ref:   (1, Cmid)
    # w2_ref:   (Cmid, Cin)      1x1 conv weights
    # b2_ref:   (1, Cin)
    # out_ref:  (1, TH, W, Cin)  float32 output tile
    # slab_ref: (M_scr, Cin)     f32 scratch: zero-padded, row-flattened activations
    _, TH, W, Cin = xm_ref.shape
    Cmid = w1_ref.shape[-1]
    Wp = W + 2                       # padded width (1 zero column each side)
    Mout = TH * Wp                   # flat output rows (incl. 2 junk columns / row)
    cdt = xm_ref.dtype               # compute dtype (bf16)
    f32 = jnp.float32

    h_idx = pl.program_id(1)
    n_h = pl.num_programs(1)

    # ---- (1) Build the zero-padded, row-flattened slab; fuse the first ReLU.
    # Zero padding is ReLU-invariant, so relu(pad(x)) == pad(relu(x)).
    slab_ref[...] = jnp.zeros_like(slab_ref)

    x_tile = xm_ref[0].astype(f32)                   # pre-ReLU, reused as residual
    x_relu = jnp.maximum(x_tile, 0.0)
    for r in range(TH):                              # one in-VMEM pass over the tile
        slab_ref[pl.ds((r + 1) * Wp + 1, W), :] = x_relu[r]

    @pl.when(h_idx > 0)                              # top halo (zeros at image edge)
    def _():
        slab_ref[pl.ds(1, W), :] = jnp.maximum(xt_ref[0, 0].astype(f32), 0.0)

    @pl.when(h_idx < n_h - 1)                        # bottom halo (zeros at image edge)
    def _():
        slab_ref[pl.ds((TH + 1) * Wp + 1, W), :] = jnp.maximum(
            xb_ref[0, 0].astype(f32), 0.0)

    # ---- (2) 3x3 conv as 9 contiguous-slice matmuls on the flat slab (f32 accum).
    acc = jnp.zeros((Mout, Cmid), dtype=f32)
    for ky in range(3):
        for kx in range(3):
            off = ky * Wp + kx                       # static, contiguous flat offset
            patch = slab_ref[pl.ds(off, Mout), :].astype(cdt)
            acc = acc + jnp.dot(patch, w1_ref[ky * 3 + kx],
                                preferred_element_type=f32)

    # ---- (3) bias + ReLU + 1x1 conv + bias.
    hid = jnp.maximum(acc + b1_ref[...].astype(f32), 0.0)
    y = jnp.dot(hid.astype(cdt), w2_ref[...],
                preferred_element_type=f32) + b2_ref[...].astype(f32)

    # ---- (4) Drop the 2 junk pad columns per row, add the pre-ReLU residual, store.
    y = y.reshape(TH, Wp, Cin)[:, :W, :]
    out_ref[0] = (y + x_tile).astype(out_ref.dtype)


def _pick_tile_h(H, W, cin, cmid, budget_bytes=4 * 1024 * 1024):
    """Largest divisor of H whose per-step working set fits a conservative VMEM budget
    (safe for v7x's smaller 64 MiB VMEM as well)."""
    best = 1
    wp = W + 2
    for th in range(1, H + 1):
        if H % th:
            continue
        est = (2 * 2 * th * W * cin                # double-buffered bf16 input tile
               + 2 * 4 * th * W * cin              # double-buffered f32 output tile
               + 4 * ((th + 2) * wp + 8) * cin     # f32 padded slab scratch
               + 4 * th * wp * (2 * cmid + cin))   # acc / hid / y live f32 values
        if est <= budget_bytes:
            best = th
    return best


def resblock_forward(x_nchw, w1_pt, b1, w2_pt, b2, *, tile_h=None,
                     compute_dtype=jnp.bfloat16):
    """x_nchw: (N, Cin, H, W). Weights in PyTorch layouts: w1 OIHW (Cmid,Cin,3,3),
    w2 (Cin,Cmid,1,1). Returns (N, Cin, H, W) float32."""
    N, Cin, H, W = x_nchw.shape
    Cmid = w1_pt.shape[0]
    cdt = compute_dtype

    if tile_h is None:
        tile_h = _pick_tile_h(H, W, Cin, Cmid)
    TH = int(tile_h)
    assert H % TH == 0, "tile_h must divide H"
    nH = H // TH
    Wp = W + 2
    m_scr = (TH + 2) * Wp + 8        # slack so tail-tap reads never leave the slab

    # Layout glue (plain JAX): NCHW -> NHWC, kernel weight layouts, bf16 cast.
    x = jnp.transpose(x_nchw, (0, 2, 3, 1)).astype(cdt)              # (N,H,W,Cin)
    w1 = jnp.transpose(w1_pt, (2, 3, 1, 0)).reshape(9, Cin, Cmid).astype(cdt)
    w2 = jnp.transpose(w2_pt[:, :, 0, 0], (1, 0)).astype(cdt)        # (Cmid,Cin)
    b1r = b1.reshape(1, Cmid).astype(cdt)
    b2r = b2.reshape(1, Cin).astype(cdt)

    out_nhwc = pl.pallas_call(
        resblock_kernel,
        out_shape=jax.ShapeDtypeStruct((N, H, W, Cin), jnp.float32),
        grid_spec=pltpu.PrefetchScalarGridSpec(
            num_scalar_prefetch=0,
            grid=(N, nH),
            in_specs=[
                # main row tile
                pl.BlockSpec((1, TH, W, Cin), lambda n, h: (n, h, 0, 0)),
                # top halo row (clamped at the image edge; kernel keeps zeros there)
                pl.BlockSpec((1, 1, W, Cin),
                             lambda n, h: (n, jnp.maximum(h * TH - 1, 0), 0, 0)),
                # bottom halo row (clamped at the image edge)
                pl.BlockSpec((1, 1, W, Cin),
                             lambda n, h: (n, jnp.minimum((h + 1) * TH, H - 1), 0, 0)),
                # small, grid-constant parameters
                pl.BlockSpec((9, Cin, Cmid), lambda n, h: (0, 0, 0)),
                pl.BlockSpec((1, Cmid), lambda n, h: (0, 0)),
                pl.BlockSpec((Cmid, Cin), lambda n, h: (0, 0)),
                pl.BlockSpec((1, Cin), lambda n, h: (0, 0)),
            ],
            out_specs=pl.BlockSpec((1, TH, W, Cin), lambda n, h: (n, h, 0, 0)),
            scratch_shapes=[pltpu.VMEM((m_scr, Cin), jnp.float32)],
        ),
        compiler_params=pltpu.CompilerParams(
            dimension_semantics=("parallel", "parallel"),
            vmem_limit_bytes=32 * 1024 * 1024,
        ),
    )(x, x, x, w1, b1r, w2, b2r)

    return jnp.transpose(out_nhwc, (0, 3, 1, 2)).astype(x_nchw.dtype)


def reference_resblock(x, w1, b1, w2, b2, quant_dtype=None):
    """Plain-JAX reference (NCHW, PyTorch semantics). With quant_dtype set, it
    quantizes at exactly the same points as the kernel (bf16 in, f32 accum)."""
    f32 = jnp.float32

    def q(a):
        return a.astype(quant_dtype).astype(f32) if quant_dtype is not None else a.astype(f32)

    xq, w1q, b1q, w2q, b2q = q(x), q(w1), q(b1), q(w2), q(b2)
    h = jax.nn.relu(xq)
    h = jax.lax.conv_general_dilated(
        h, w1q, window_strides=(1, 1), padding=((1, 1), (1, 1)),
        dimension_numbers=("NCHW", "OIHW", "NCHW")) + b1q[None, :, None, None]
    h = jax.nn.relu(h)
    h = q(h)  # kernel casts the hidden activation to bf16 before the 1x1 matmul
    h = jax.lax.conv_general_dilated(
        h, w2q, window_strides=(1, 1), padding="VALID",
        dimension_numbers=("NCHW", "OIHW", "NCHW")) + b2q[None, :, None, None]
    return h + xq


if __name__ == "__main__":
    N, Cin, Cmid, H, W = 2, 4, 8, 16, 16

    key = jax.random.PRNGKey(0)
    k_x, k_w1, k_b1, k_w2, k_b2 = jax.random.split(key, 5)

    x = jax.random.normal(k_x, (N, Cin, H, W), dtype=jnp.float32)
    # Deterministic synthetic parameters (PyTorch weight layouts).
    w1 = jax.random.normal(k_w1, (Cmid, Cin, 3, 3), dtype=jnp.float32) * 0.1
    b1 = jax.random.normal(k_b1, (Cmid,), dtype=jnp.float32) * 0.1
    w2 = jax.random.normal(k_w2, (Cin, Cmid, 1, 1), dtype=jnp.float32) * 0.1
    b2 = jax.random.normal(k_b2, (Cin,), dtype=jnp.float32) * 0.1

    # tile_h=8 exercises the H-tiling + halo path (grid = (2, 2), even for megacore).
    out = jax.block_until_ready(resblock_forward(x, w1, b1, w2, b2, tile_h=8))

    ref = jax.block_until_ready(
        reference_resblock(x, w1, b1, w2, b2, quant_dtype=jnp.bfloat16))
    assert out.shape == ref.shape == (N, Cin, H, W)
    assert jnp.max(jnp.abs(out - ref)) < 1e-3, "mismatch vs reference"

    print("KERNEL_OK")
</pallas_src>

<mosaic_0001>
module attributes {stable_mosaic.version = 11 : i64} {
  func.func @resblock_kernel(%arg0: i32, %arg1: i32, %arg2: memref<1x8x16x4xbf16, #tpu.memory_space<vmem>>, %arg3: memref<1x1x16x4xbf16, #tpu.memory_space<vmem>>, %arg4: memref<1x1x16x4xbf16, #tpu.memory_space<vmem>>, %arg5: memref<9x4x8xbf16, #tpu.memory_space<vmem>>, %arg6: memref<1x8xbf16, #tpu.memory_space<vmem>>, %arg7: memref<8x4xbf16, #tpu.memory_space<vmem>>, %arg8: memref<1x4xbf16, #tpu.memory_space<vmem>>, %arg9: memref<1x8x16x4xf32, #tpu.memory_space<vmem>>, %arg10: memref<188x4xf32, #tpu.memory_space<vmem>>) attributes {dimension_semantics = [#tpu.dimension_semantics<parallel>, #tpu.dimension_semantics<parallel>], iteration_bounds = array<i64: 2, 2>, scalar_prefetch = 0 : i64, scratch_operands = 1 : i64, tpu.core_type = #tpu.core_type<tc>, window_params = [{transform_indices = @transform_0, window_bounds = array<i64: 1, 8, 16, 4>}, {transform_indices = @transform_1, window_bounds = array<i64: 1, 1, 16, 4>}, {transform_indices = @transform_2, window_bounds = array<i64: 1, 1, 16, 4>}, {pipeline_mode = #tpu.pipeline_mode<synchronous>, transform_indices = @transform_3, window_bounds = array<i64: 9, 4, 8>}, {pipeline_mode = #tpu.pipeline_mode<synchronous>, transform_indices = @transform_4, window_bounds = array<i64: 1, 8>}, {pipeline_mode = #tpu.pipeline_mode<synchronous>, transform_indices = @transform_5, window_bounds = array<i64: 8, 4>}, {pipeline_mode = #tpu.pipeline_mode<synchronous>, transform_indices = @transform_6, window_bounds = array<i64: 1, 4>}, {transform_indices = @transform_7, window_bounds = array<i64: 1, 8, 16, 4>}]} {
    %cst = arith.constant 0.000000e+00 : f32
    %0 = vector.broadcast %cst : f32 to vector<188x4xf32>
    %c0 = arith.constant 0 : index
    %c0_0 = arith.constant 0 : index
    %1 = vector.load %arg10[%c0, %c0_0] : memref<188x4xf32, #tpu.memory_space<vmem>>, vector<188x4xf32>
    tpu.vector_store %arg10[%c0, %c0_0], %0 {strides = array<i32>} : memref<188x4xf32, #tpu.memory_space<vmem>>, vector<188x4xf32>,
    %c0_1 = arith.constant 0 : index
    %c0_2 = arith.constant 0 : index
    %c0_3 = arith.constant 0 : index
    %c0_4 = arith.constant 0 : index
    %2 = vector.load %arg2[%c0_1, %c0_2, %c0_3, %c0_4] : memref<1x8x16x4xbf16, #tpu.memory_space<vmem>>, vector<1x8x16x4xbf16>
    %3 = vector.shape_cast %2 : vector<1x8x16x4xbf16> to vector<8x16x4xbf16>
    %4 = arith.extf %3 : vector<8x16x4xbf16> to vector<8x16x4xf32>
    %cst_5 = arith.constant 0.000000e+00 : f32
    %5 = vector.broadcast %cst_5 : f32 to vector<8x16x4xf32>
    %6 = arith.maximumf %4, %5 : vector<8x16x4xf32>
    %7 = vector.extract_strided_slice %6 {offsets = [0, 0, 0], sizes = [1, 16, 4], strides = [1, 1, 1]} : vector<8x16x4xf32> to vector<1x16x4xf32>
    %8 = vector.shape_cast %7 : vector<1x16x4xf32> to vector<16x4xf32>
    %c19 = arith.constant 19 : index
    %c0_6 = arith.constant 0 : index
    %9 = vector.load %arg10[%c19, %c0_6] : memref<188x4xf32, #tpu.memory_space<vmem>>, vector<16x4xf32>
    tpu.vector_store %arg10[%c19, %c0_6], %8 {strides = array<i32>} : memref<188x4xf32, #tpu.memory_space<vmem>>, vector<16x4xf32>,
    %10 = vector.extract_strided_slice %6 {offsets = [1, 0, 0], sizes = [1, 16, 4], strides = [1, 1, 1]} : vector<8x16x4xf32> to vector<1x16x4xf32>
    %11 = vector.shape_cast %10 : vector<1x16x4xf32> to vector<16x4xf32>
    %c37 = arith.constant 37 : index
    %c0_7 = arith.constant 0 : index
    %12 = vector.load %arg10[%c37, %c0_7] : memref<188x4xf32, #tpu.memory_space<vmem>>, vector<16x4xf32>
    tpu.vector_store %arg10[%c37, %c0_7], %11 {strides = array<i32>} : memref<188x4xf32, #tpu.memory_space<vmem>>, vector<16x4xf32>,
    %13 = vector.extract_strided_slice %6 {offsets = [2, 0, 0], sizes = [1, 16, 4], strides = [1, 1, 1]} : vector<8x16x4xf32> to vector<1x16x4xf32>
    %14 = vector.shape_cast %13 : vector<1x16x4xf32> to vector<16x4xf32>
    %c55 = arith.constant 55 : index
    %c0_8 = arith.constant 0 : index
    %15 = vector.load %arg10[%c55, %c0_8] : memref<188x4xf32, #tpu.memory_space<vmem>>, vector<16x4xf32>
    tpu.vector_store %arg10[%c55, %c0_8], %14 {strides = array<i32>} : memref<188x4xf32, #tpu.memory_space<vmem>>, vector<16x4xf32>,
    %16 = vector.extract_strided_slice %6 {offsets = [3, 0, 0], sizes = [1, 16, 4], strides = [1, 1, 1]} : vector<8x16x4xf32> to vector<1x16x4xf32>
    %17 = vector.shape_cast %16 : vector<1x16x4xf32> to vector<16x4xf32>
    %c73 = arith.constant 73 : index
    %c0_9 = arith.constant 0 : index
    %18 = vector.load %arg10[%c73, %c0_9] : memref<188x4xf32, #tpu.memory_space<vmem>>, vector<16x4xf32>
    tpu.vector_store %arg10[%c73, %c0_9], %17 {strides = array<i32>} : memref<188x4xf32, #tpu.memory_space<vmem>>, vector<16x4xf32>,
    %19 = vector.extract_strided_slice %6 {offsets = [4, 0, 0], sizes = [1, 16, 4], strides = [1, 1, 1]} : vector<8x16x4xf32> to vector<1x16x4xf32>
    %20 = vector.shape_cast %19 : vector<1x16x4xf32> to vector<16x4xf32>
    %c91 = arith.constant 91 : index
    %c0_10 = arith.constant 0 : index
    %21 = vector.load %arg10[%c91, %c0_10] : memref<188x4xf32, #tpu.memory_space<vmem>>, vector<16x4xf32>
    tpu.vector_store %arg10[%c91, %c0_10], %20 {strides = array<i32>} : memref<188x4xf32, #tpu.memory_space<vmem>>, vector<16x4xf32>,
    %22 = vector.extract_strided_slice %6 {offsets = [5, 0, 0], sizes = [1, 16, 4], strides = [1, 1, 1]} : vector<8x16x4xf32> to vector<1x16x4xf32>
    %23 = vector.shape_cast %22 : vector<1x16x4xf32> to vector<16x4xf32>
    %c109 = arith.constant 109 : index
    %c0_11 = arith.constant 0 : index
    %24 = vector.load %arg10[%c109, %c0_11] : memref<188x4xf32, #tpu.memory_space<vmem>>, vector<16x4xf32>
    tpu.vector_store %arg10[%c109, %c0_11], %23 {strides = array<i32>} : memref<188x4xf32, #tpu.memory_space<vmem>>, vector<16x4xf32>,
    %25 = vector.extract_strided_slice %6 {offsets = [6, 0, 0], sizes = [1, 16, 4], strides = [1, 1, 1]} : vector<8x16x4xf32> to vector<1x16x4xf32>
    %26 = vector.shape_cast %25 : vector<1x16x4xf32> to vector<16x4xf32>
    %c127 = arith.constant 127 : index
    %c0_12 = arith.constant 0 : index
    %27 = vector.load %arg10[%c127, %c0_12] : memref<188x4xf32, #tpu.memory_space<vmem>>, vector<16x4xf32>
    tpu.vector_store %arg10[%c127, %c0_12], %26 {strides = array<i32>} : memref<188x4xf32, #tpu.memory_space<vmem>>, vector<16x4xf32>,
    %28 = vector.extract_strided_slice %6 {offsets = [7, 0, 0], sizes = [1, 16, 4], strides = [1, 1, 1]} : vector<8x16x4xf32> to vector<1x16x4xf32>
    %29 = vector.shape_cast %28 : vector<1x16x4xf32> to vector<16x4xf32>
    %c145 = arith.constant 145 : index
    %c0_13 = arith.constant 0 : index
    %30 = vector.load %arg10[%c145, %c0_13] : memref<188x4xf32, #tpu.memory_space<vmem>>, vector<16x4xf32>
    tpu.vector_store %arg10[%c145, %c0_13], %29 {strides = array<i32>} : memref<188x4xf32, #tpu.memory_space<vmem>>, vector<16x4xf32>,
    %c0_i32 = arith.constant 0 : i32
    %31 = arith.cmpi sgt, %arg1, %c0_i32 : i32
    %32 = arith.extui %31 : i1 to i32
    %c0_i32_14 = arith.constant 0 : i32
    %33 = arith.cmpi ne, %32, %c0_i32_14 : i32
    scf.if %33 {
      %c0_71 = arith.constant 0 : index
      %c0_72 = arith.constant 0 : index
      %c0_73 = arith.constant 0 : index
      %c0_74 = arith.constant 0 : index
      %111 = vector.load %arg3[%c0_71, %c0_72, %c0_73, %c0_74] : memref<1x1x16x4xbf16, #tpu.memory_space<vmem>>, vector<1x1x16x4xbf16>
      %112 = vector.shape_cast %111 : vector<1x1x16x4xbf16> to vector<16x4xbf16>
      %113 = arith.extf %112 : vector<16x4xbf16> to vector<16x4xf32>
      %cst_75 = arith.constant 0.000000e+00 : f32
      %114 = vector.broadcast %cst_75 : f32 to vector<16x4xf32>
      %115 = arith.maximumf %113, %114 : vector<16x4xf32>
      %c1_76 = arith.constant 1 : index
      %c0_77 = arith.constant 0 : index
      %116 = vector.load %arg10[%c1_76, %c0_77] : memref<188x4xf32, #tpu.memory_space<vmem>>, vector<16x4xf32>
      tpu.vector_store %arg10[%c1_76, %c0_77], %115 {strides = array<i32>} : memref<188x4xf32, #tpu.memory_space<vmem>>, vector<16x4xf32>,
    } else {
    }
    %c1_i32 = arith.constant 1 : i32
    %34 = arith.cmpi slt, %arg1, %c1_i32 : i32
    %35 = arith.extui %34 : i1 to i32
    %c0_i32_15 = arith.constant 0 : i32
    %36 = arith.cmpi ne, %35, %c0_i32_15 : i32
    scf.if %36 {
      %c0_71 = arith.constant 0 : index
      %c0_72 = arith.constant 0 : index
      %c0_73 = arith.constant 0 : index
      %c0_74 = arith.constant 0 : index
      %111 = vector.load %arg4[%c0_71, %c0_72, %c0_73, %c0_74] : memref<1x1x16x4xbf16, #tpu.memory_space<vmem>>, vector<1x1x16x4xbf16>
      %112 = vector.shape_cast %111 : vector<1x1x16x4xbf16> to vector<16x4xbf16>
      %113 = arith.extf %112 : vector<16x4xbf16> to vector<16x4xf32>
      %cst_75 = arith.constant 0.000000e+00 : f32
      %114 = vector.broadcast %cst_75 : f32 to vector<16x4xf32>
      %115 = arith.maximumf %113, %114 : vector<16x4xf32>
      %c163 = arith.constant 163 : index
      %c0_76 = arith.constant 0 : index
      %116 = vector.load %arg10[%c163, %c0_76] : memref<188x4xf32, #tpu.memory_space<vmem>>, vector<16x4xf32>
      tpu.vector_store %arg10[%c163, %c0_76], %115 {strides = array<i32>} : memref<188x4xf32, #tpu.memory_space<vmem>>, vector<16x4xf32>,
    } else {
    }
    %cst_16 = arith.constant 0.000000e+00 : f32
    %37 = vector.broadcast %cst_16 : f32 to vector<144x8xf32>
    %c0_17 = arith.constant 0 : index
    %c0_18 = arith.constant 0 : index
    %38 = vector.load %arg10[%c0_17, %c0_18] : memref<188x4xf32, #tpu.memory_space<vmem>>, vector<144x4xf32>
    %39 = arith.truncf %38 : vector<144x4xf32> to vector<144x4xbf16>
    %c0_19 = arith.constant 0 : index
    %c0_20 = arith.constant 0 : index
    %c0_21 = arith.constant 0 : index
    %40 = vector.load %arg5[%c0_19, %c0_20, %c0_21] : memref<9x4x8xbf16, #tpu.memory_space<vmem>>, vector<1x4x8xbf16>
    %41 = vector.shape_cast %40 : vector<1x4x8xbf16> to vector<4x8xbf16>
    %cst_22 = arith.constant dense<0.000000e+00> : vector<144x8xf32>
    %42 = tpu.matmul %39, %41, %cst_22 {dimension_numbers = #tpu.dot_dimension_numbers<[1], [0], [0], [1], [0, 0, 1, 1], [], []>} : vector<144x4xbf16>, vector<4x8xbf16>, vector<144x8xf32> -> vector<144x8xf32>
    %43 = arith.addf %37, %42 : vector<144x8xf32>
    %c1 = arith.constant 1 : index
    %c0_23 = arith.constant 0 : index
    %44 = vector.load %arg10[%c1, %c0_23] : memref<188x4xf32, #tpu.memory_space<vmem>>, vector<144x4xf32>
    %45 = arith.truncf %44 : vector<144x4xf32> to vector<144x4xbf16>
    %c1_24 = arith.constant 1 : index
    %c0_25 = arith.constant 0 : index
    %c0_26 = arith.constant 0 : index
    %46 = vector.load %arg5[%c1_24, %c0_25, %c0_26] : memref<9x4x8xbf16, #tpu.memory_space<vmem>>, vector<1x4x8xbf16>
    %47 = vector.shape_cast %46 : vector<1x4x8xbf16> to vector<4x8xbf16>
    %cst_27 = arith.constant dense<0.000000e+00> : vector<144x8xf32>
    %48 = tpu.matmul %45, %47, %cst_27 {dimension_numbers = #tpu.dot_dimension_numbers<[1], [0], [0], [1], [0, 0, 1, 1], [], []>} : vector<144x4xbf16>, vector<4x8xbf16>, vector<144x8xf32> -> vector<144x8xf32>
    %49 = arith.addf %43, %48 : vector<144x8xf32>
    %c2 = arith.constant 2 : index
    %c0_28 = arith.constant 0 : index
    %50 = vector.load %arg10[%c2, %c0_28] : memref<188x4xf32, #tpu.memory_space<vmem>>, vector<144x4xf32>
    %51 = arith.truncf %50 : vector<144x4xf32> to vector<144x4xbf16>
    %c2_29 = arith.constant 2 : index
    %c0_30 = arith.constant 0 : index
    %c0_31 = arith.constant 0 : index
    %52 = vector.load %arg5[%c2_29, %c0_30, %c0_31] : memref<9x4x8xbf16, #tpu.memory_space<vmem>>, vector<1x4x8xbf16>
    %53 = vector.shape_cast %52 : vector<1x4x8xbf16> to vector<4x8xbf16>
    %cst_32 = arith.constant dense<0.000000e+00> : vector<144x8xf32>
    %54 = tpu.matmul %51, %53, %cst_32 {dimension_numbers = #tpu.dot_dimension_numbers<[1], [0], [0], [1], [0, 0, 1, 1], [], []>} : vector<144x4xbf16>, vector<4x8xbf16>, vector<144x8xf32> -> vector<144x8xf32>
    %55 = arith.addf %49, %54 : vector<144x8xf32>
    %c18 = arith.constant 18 : index
    %c0_33 = arith.constant 0 : index
    %56 = vector.load %arg10[%c18, %c0_33] : memref<188x4xf32, #tpu.memory_space<vmem>>, vector<144x4xf32>
    %57 = arith.truncf %56 : vector<144x4xf32> to vector<144x4xbf16>
    %c3 = arith.constant 3 : index
    %c0_34 = arith.constant 0 : index
    %c0_35 = arith.constant 0 : index
    %58 = vector.load %arg5[%c3, %c0_34, %c0_35] : memref<9x4x8xbf16, #tpu.memory_space<vmem>>, vector<1x4x8xbf16>
    %59 = vector.shape_cast %58 : vector<1x4x8xbf16> to vector<4x8xbf16>
    %cst_36 = arith.constant dense<0.000000e+00> : vector<144x8xf32>
    %60 = tpu.matmul %57, %59, %cst_36 {dimension_numbers = #tpu.dot_dimension_numbers<[1], [0], [0], [1], [0, 0, 1, 1], [], []>} : vector<144x4xbf16>, vector<4x8xbf16>, vector<144x8xf32> -> vector<144x8xf32>
    %61 = arith.addf %55, %60 : vector<144x8xf32>
    %c19_37 = arith.constant 19 : index
    %c0_38 = arith.constant 0 : index
    %62 = vector.load %arg10[%c19_37, %c0_38] : memref<188x4xf32, #tpu.memory_space<vmem>>, vector<144x4xf32>
    %63 = arith.truncf %62 : vector<144x4xf32> to vector<144x4xbf16>
    %c4 = arith.constant 4 : index
    %c0_39 = arith.constant 0 : index
    %c0_40 = arith.constant 0 : index
    %64 = vector.load %arg5[%c4, %c0_39, %c0_40] : memref<9x4x8xbf16, #tpu.memory_space<vmem>>, vector<1x4x8xbf16>
    %65 = vector.shape_cast %64 : vector<1x4x8xbf16> to vector<4x8xbf16>
    %cst_41 = arith.constant dense<0.000000e+00> : vector<144x8xf32>
    %66 = tpu.matmul %63, %65, %cst_41 {dimension_numbers = #tpu.dot_dimension_numbers<[1], [0], [0], [1], [0, 0, 1, 1], [], []>} : vector<144x4xbf16>, vector<4x8xbf16>, vector<144x8xf32> -> vector<144x8xf32>
    %67 = arith.addf %61, %66 : vector<144x8xf32>
    %c20 = arith.constant 20 : index
    %c0_42 = arith.constant 0 : index
    %68 = vector.load %arg10[%c20, %c0_42] : memref<188x4xf32, #tpu.memory_space<vmem>>, vector<144x4xf32>
    %69 = arith.truncf %68 : vector<144x4xf32> to vector<144x4xbf16>
    %c5 = arith.constant 5 : index
    %c0_43 = arith.constant 0 : index
    %c0_44 = arith.constant 0 : index
    %70 = vector.load %arg5[%c5, %c0_43, %c0_44] : memref<9x4x8xbf16, #tpu.memory_space<vmem>>, vector<1x4x8xbf16>
    %71 = vector.shape_cast %70 : vector<1x4x8xbf16> to vector<4x8xbf16>
    %cst_45 = arith.constant dense<0.000000e+00> : vector<144x8xf32>
    %72 = tpu.matmul %69, %71, %cst_45 {dimension_numbers = #tpu.dot_dimension_numbers<[1], [0], [0], [1], [0, 0, 1, 1], [], []>} : vector<144x4xbf16>, vector<4x8xbf16>, vector<144x8xf32> -> vector<144x8xf32>
    %73 = arith.addf %67, %72 : vector<144x8xf32>
    %c36 = arith.constant 36 : index
    %c0_46 = arith.constant 0 : index
    %74 = vector.load %arg10[%c36, %c0_46] : memref<188x4xf32, #tpu.memory_space<vmem>>, vector<144x4xf32>
    %75 = arith.truncf %74 : vector<144x4xf32> to vector<144x4xbf16>
    %c6 = arith.constant 6 : index
    %c0_47 = arith.constant 0 : index
    %c0_48 = arith.constant 0 : index
    %76 = vector.load %arg5[%c6, %c0_47, %c0_48] : memref<9x4x8xbf16, #tpu.memory_space<vmem>>, vector<1x4x8xbf16>
    %77 = vector.shape_cast %76 : vector<1x4x8xbf16> to vector<4x8xbf16>
    %cst_49 = arith.constant dense<0.000000e+00> : vector<144x8xf32>
    %78 = tpu.matmul %75, %77, %cst_49 {dimension_numbers = #tpu.dot_dimension_numbers<[1], [0], [0], [1], [0, 0, 1, 1], [], []>} : vector<144x4xbf16>, vector<4x8xbf16>, vector<144x8xf32> -> vector<144x8xf32>
    %79 = arith.addf %73, %78 : vector<144x8xf32>
    %c37_50 = arith.constant 37 : index
    %c0_51 = arith.constant 0 : index
    %80 = vector.load %arg10[%c37_50, %c0_51] : memref<188x4xf32, #tpu.memory_space<vmem>>, vector<144x4xf32>
    %81 = arith.truncf %80 : vector<144x4xf32> to vector<144x4xbf16>
    %c7 = arith.constant 7 : index
    %c0_52 = arith.constant 0 : index
    %c0_53 = arith.constant 0 : index
    %82 = vector.load %arg5[%c7, %c0_52, %c0_53] : memref<9x4x8xbf16, #tpu.memory_space<vmem>>, vector<1x4x8xbf16>
    %83 = vector.shape_cast %82 : vector<1x4x8xbf16> to vector<4x8xbf16>
    %cst_54 = arith.constant dense<0.000000e+00> : vector<144x8xf32>
    %84 = tpu.matmul %81, %83, %cst_54 {dimension_numbers = #tpu.dot_dimension_numbers<[1], [0], [0], [1], [0, 0, 1, 1], [], []>} : vector<144x4xbf16>, vector<4x8xbf16>, vector<144x8xf32> -> vector<144x8xf32>
    %85 = arith.addf %79, %84 : vector<144x8xf32>
    %c38 = arith.constant 38 : index
    %c0_55 = arith.constant 0 : index
    %86 = vector.load %arg10[%c38, %c0_55] : memref<188x4xf32, #tpu.memory_space<vmem>>, vector<144x4xf32>
    %87 = arith.truncf %86 : vector<144x4xf32> to vector<144x4xbf16>
    %c8 = arith.constant 8 : index
    %c0_56 = arith.constant 0 : index
    %c0_57 = arith.constant 0 : index
    %88 = vector.load %arg5[%c8, %c0_56, %c0_57] : memref<9x4x8xbf16, #tpu.memory_space<vmem>>, vector<1x4x8xbf16>
    %89 = vector.shape_cast %88 : vector<1x4x8xbf16> to vector<4x8xbf16>
    %cst_58 = arith.constant dense<0.000000e+00> : vector<144x8xf32>
    %90 = tpu.matmul %87, %89, %cst_58 {dimension_numbers = #tpu.dot_dimension_numbers<[1], [0], [0], [1], [0, 0, 1, 1], [], []>} : vector<144x4xbf16>, vector<4x8xbf16>, vector<144x8xf32> -> vector<144x8xf32>
    %91 = arith.addf %85, %90 : vector<144x8xf32>
    %c0_59 = arith.constant 0 : index
    %c0_60 = arith.constant 0 : index
    %92 = vector.load %arg6[%c0_59, %c0_60] : memref<1x8xbf16, #tpu.memory_space<vmem>>, vector<1x8xbf16>
    %93 = arith.extf %92 : vector<1x8xbf16> to vector<1x8xf32>
    %94 = vector.broadcast %93 : vector<1x8xf32> to vector<144x8xf32>
    %95 = arith.addf %91, %94 : vector<144x8xf32>
    %cst_61 = arith.constant 0.000000e+00 : f32
    %96 = vector.broadcast %cst_61 : f32 to vector<144x8xf32>
    %97 = arith.maximumf %95, %96 : vector<144x8xf32>
    %98 = arith.truncf %97 : vector<144x8xf32> to vector<144x8xbf16>
    %c0_62 = arith.constant 0 : index
    %c0_63 = arith.constant 0 : index
    %99 = vector.load %arg7[%c0_62, %c0_63] : memref<8x4xbf16, #tpu.memory_space<vmem>>, vector<8x4xbf16>
    %cst_64 = arith.constant dense<0.000000e+00> : vector<144x4xf32>
    %100 = tpu.matmul %98, %99, %cst_64 {dimension_numbers = #tpu.dot_dimension_numbers<[1], [0], [0], [1], [0, 0, 1, 1], [], []>} : vector<144x8xbf16>, vector<8x4xbf16>, vector<144x4xf32> -> vector<144x4xf32>
    %c0_65 = arith.constant 0 : index
    %c0_66 = arith.constant 0 : index
    %101 = vector.load %arg8[%c0_65, %c0_66] : memref<1x4xbf16, #tpu.memory_space<vmem>>, vector<1x4xbf16>
    %102 = arith.extf %101 : vector<1x4xbf16> to vector<1x4xf32>
    %103 = vector.broadcast %102 : vector<1x4xf32> to vector<144x4xf32>
    %104 = arith.addf %100, %103 : vector<144x4xf32>
    %105 = vector.shape_cast %104 : vector<144x4xf32> to vector<8x18x4xf32>
    %106 = vector.extract_strided_slice %105 {offsets = [0, 0, 0], sizes = [8, 16, 4], strides = [1, 1, 1]} : vector<8x18x4xf32> to vector<8x16x4xf32>
    %107 = arith.addf %106, %4 : vector<8x16x4xf32>
    %c0_67 = arith.constant 0 : index
    %c0_68 = arith.constant 0 : index
    %c0_69 = arith.constant 0 : index
    %c0_70 = arith.constant 0 : index
    %108 = vector.load %arg9[%c0_67, %c0_68, %c0_69, %c0_70] : memref<1x8x16x4xf32, #tpu.memory_space<vmem>>, vector<1x8x16x4xf32>
    %109 = vector.shape_cast %108 : vector<1x8x16x4xf32> to vector<8x16x4xf32>
    %110 = vector.shape_cast %107 : vector<8x16x4xf32> to vector<1x8x16x4xf32>
    tpu.vector_store %arg9[%c0_67, %c0_68, %c0_69, %c0_70], %110 {strides = array<i32>} : memref<1x8x16x4xf32, #tpu.memory_space<vmem>>, vector<1x8x16x4xf32>,
    return
  }
  func.func @transform_0(%arg0: i32, %arg1: i32) -> (i32, i32, i32, i32) {
    %c0_i32 = arith.constant 0 : i32
    %c0_i32_0 = arith.constant 0 : i32
    %c0_i32_1 = arith.constant 0 : i32
    return %arg0, %arg1, %c0_i32, %c0_i32_0 : i32, i32, i32, i32
  }
  func.func @transform_1(%arg0: i32, %arg1: i32) -> (i32, i32, i32, i32) {
    %c8_i32 = arith.constant 8 : i32
    %0 = arith.muli %arg1, %c8_i32 : i32
    %c1_i32 = arith.constant 1 : i32
    %1 = arith.subi %0, %c1_i32 : i32
    %c0_i32 = arith.constant 0 : i32
    %2 = arith.maxsi %1, %c0_i32 : i32
    %c0_i32_0 = arith.constant 0 : i32
    %c0_i32_1 = arith.constant 0 : i32
    %c0_i32_2 = arith.constant 0 : i32
    return %arg0, %2, %c0_i32_0, %c0_i32_1 : i32, i32, i32, i32
  }
  func.func @transform_2(%arg0: i32, %arg1: i32) -> (i32, i32, i32, i32) {
    %c1_i32 = arith.constant 1 : i32
    %0 = arith.addi %arg1, %c1_i32 : i32
    %c8_i32 = arith.constant 8 : i32
    %1 = arith.muli %0, %c8_i32 : i32
    %c15_i32 = arith.constant 15 : i32
    %2 = arith.minsi %1, %c15_i32 : i32
    %c0_i32 = arith.constant 0 : i32
    %c0_i32_0 = arith.constant 0 : i32
    %c0_i32_1 = arith.constant 0 : i32
    return %arg0, %2, %c0_i32, %c0_i32_0 : i32, i32, i32, i32
  }
  func.func @transform_3(%arg0: i32, %arg1: i32) -> (i32, i32, i32) {
    %c0_i32 = arith.constant 0 : i32
    %c0_i32_0 = arith.constant 0 : i32
    %c0_i32_1 = arith.constant 0 : i32
    %c0_i32_2 = arith.constant 0 : i32
    return %c0_i32, %c0_i32_0, %c0_i32_1 : i32, i32, i32
  }
  func.func @transform_4(%arg0: i32, %arg1: i32) -> (i32, i32) {
    %c0_i32 = arith.constant 0 : i32
    %c0_i32_0 = arith.constant 0 : i32
    %c0_i32_1 = arith.constant 0 : i32
    return %c0_i32, %c0_i32_0 : i32, i32
  }
  func.func @transform_5(%arg0: i32, %arg1: i32) -> (i32, i32) {
    %c0_i32 = arith.constant 0 : i32
    %c0_i32_0 = arith.constant 0 : i32
    %c0_i32_1 = arith.constant 0 : i32
    return %c0_i32, %c0_i32_0 : i32, i32
  }
  func.func @transform_6(%arg0: i32, %arg1: i32) -> (i32, i32) {
    %c0_i32 = arith.constant 0 : i32
    %c0_i32_0 = arith.constant 0 : i32
    %c0_i32_1 = arith.constant 0 : i32
    return %c0_i32, %c0_i32_0 : i32, i32
  }
  func.func @transform_7(%arg0: i32, %arg1: i32) -> (i32, i32, i32, i32) {
    %c0_i32 = arith.constant 0 : i32
    %c0_i32_0 = arith.constant 0 : i32
    %c0_i32_1 = arith.constant 0 : i32
    return %arg0, %arg1, %c0_i32, %c0_i32_0 : i32, i32, i32, i32
  }
}

</mosaic_0001>

<bundles_post_ra>
// kernel: tpu_custom_call.1
= control target key start
LH: loop header
LB: loop body
LE: loop exit
PB: predicated region body
PF: predicated region fallthrough
CT: control target
= control target key end

     0   :  { %s4467_s24 = smov 0   ;;  %s4469_s25 = smov 0   ;;  %s5685_s0 = inlined_call_operand.vmem [shape: bf16[2,16,16,4], index: 0, kind: input, shape index: {}]   ;;  %s5686_s1 = inlined_call_operand.vmem [shape: bf16[2,16,16,4], index: 1, kind: input, shape index: {}]   ;;  %s5687_s2 = inlined_call_operand.vmem [shape: bf16[2,16,16,4], index: 2, kind: input, shape index: {}]   ;;  %s5688_s3 = inlined_call_operand.vmem [shape: bf16[9,4,8], index: 3, kind: input, shape index: {}]   ;;  %s5689_s4 = inlined_call_operand.vmem [shape: bf16[1,8], index: 4, kind: input, shape index: {}]   ;;  %s5690_s5 = inlined_call_operand.vmem [shape: bf16[8,4], index: 5, kind: input, shape index: {}]   ;;  %s5691_s6 = inlined_call_operand.vmem [shape: bf16[1,4], index: 6, kind: input, shape index: {}]   ;;  %s5692_s7 = inlined_call_operand.vmem [shape: f32[2,16,16,4], index: 7, kind: output, shape index: {}]  }
   0x1   :  { %s4471_s26 = smov 0   ;;  %s4473_s27 = smov 0  }
   0x2   :  { %s4475_s28 = smov 0  }
   0x3 LB: > { %s26_s29 = sadd.s32 1, %s4414_s26  ;;  %s29_s30 = sadd.s32 1, %s4418_s27  ;;  %s4422_s28 = sphi %s4475_s28, %s17_s28   ;;  %s4418_s27 = sphi %s4473_s27, %s5697_s27   ;;  %s4414_s26 = sphi %s4471_s26, %s5696_s26   ;;  %s4410_s25 = sphi %s4469_s25, %s5695_s25   ;;  %s4406_s24 = sphi %s4467_s24, %s5694_s24  }
   0x4   : > { %p27_p0 = scmp.ge.s32.totalorder %s26_s29, 2  ;;  %p3678_p1 = scmp.ge.s32.totalorder %s4422_s28, 1 }
   0x5   : > { %p323_p2 = scmp.lt.s32.totalorder %s4422_s28, 5 }
   0x6   : > { %s5699_s29 = smov (%p27_p0, %s26_s29), 0  ;;  %s5701_s30 = smov (!%p27_p0, %s29_s30), %s4418_s27 }
   0x7   : > { %p324_p3 = pnand %p3678_p1, %p323_p2  ;;  %p31_p4 = scmp.ge.s32.totalorder %s5701_s30, 2 }
   0x8   : > { %s4502_s8 = sshll.u32 (!%p324_p3), %s4406_s24, 3  ;;  %p392_p5 = scmp.lt.s32.totalorder (!%p324_p3), %s4410_s25, 1 }
   0x9   : > { %s5703_s30 = smov (%p31_p4, %s5701_s30), 0  ;;  %327 = sbr.rel (%p324_p3) target bundleno = 829 (0x33d), region = 48 }
   0xa   : > { %p394_p6 = scmp.lt.s32.totalorder (!%p324_p3), %s4502_s8, 15  ;;  %s3684_s9 = sadd.s32 (!%p324_p3), 4294967295, %s4502_s8 }
   0xb   : > { %p404_p7 = scmp.gt.s32.totalorder (!%p324_p3), %s3684_s9, 0  ;;  %p3685_p8 = scmp.lt.s32.totalorder (!%p324_p3), %s3684_s9, 15 }
   0xc   : > { %s3813_s14 = sadd.s32 (!%p324_p3), 8, %s4502_s8  ;;  %p3704_p10 = scmp.le.s32.totalorder (!%p324_p3), %s4406_s24, 0 }
   0xd   : > { %p4564_p9 = scmp.lt.s32.totalorder (!%p324_p3), %s3813_s14, 15 }
   0xe   : > { %vm448_vm0 = vcmask 31744   ;;  %v4424_v0 = vmov 0.0   ;;  %s5705_s25 = smov (!%p392_p5, %s4410_s25), 1 }
   0xf   : > { %451 = vst.msk [vmem:[#allocation2 + $0x10] sm:$0xff] %vm448_vm0, %v4424_v0  ;;  %449 = vst.msk [vmem:[#allocation2] sm:$0xff] %vm448_vm0, %v4424_v0  ;;  %s395_s10 = scalar_select %p394_p6, %s4502_s8, 15 }
  0x10   : > { %450 = vst.msk [vmem:[#allocation2 + $0x8] sm:$0xff] %vm448_vm0, %v4424_v0  ;;  %452 = vst.msk [vmem:[#allocation2 + $0x18] sm:$0xff] %vm448_vm0, %v4424_v0  ;;  %s4557_s11 = sshll.u32 %s5705_s25, 5  ;;  %s5707_s14 = smov (!%p4564_p9, %s3813_s14), 15 }
  0x11   : > { %453 = vst.msk [vmem:[#allocation2 + $0x20] sm:$0xff] %vm448_vm0, %v4424_v0  ;;  %454 = vst.msk [vmem:[#allocation2 + $0x28] sm:$0xff] %vm448_vm0, %v4424_v0  ;;  %s3680_s12 = sshll.u32 %s395_s10, 1  ;;  %s5711_s14 = smov (!%p4564_p9, %s5707_s14), 15 }
  0x12   : > { %455 = vst.msk [vmem:[#allocation2 + $0x30] sm:$0xff] %vm448_vm0, %v4424_v0  ;;  %456 = vst.msk [vmem:[#allocation2 + $0x38] sm:$0xff] %vm448_vm0, %v4424_v0  ;;  %s4560_s13 = sadd.s32 %s4557_s11, %s3680_s12  ;;  %s3697_s10 = sshll.u32 %s5711_s14, 1 }
  0x13   : > { %457 = vst.msk [vmem:[#allocation2 + $0x40] sm:$0xff] %vm448_vm0, %v4424_v0  ;;  %458 = vst.msk [vmem:[#allocation2 + $0x48] sm:$0xff] %vm448_vm0, %v4424_v0  ;;  %s3682_s15 = sshll.u32 %s4560_s13, 2  ;;  %s3703_s20 = sshll.u32 %s4560_s13, 3 }
  0x14   : > { %459 = vst.msk [vmem:[#allocation2 + $0x50] sm:$0xff] %vm448_vm0, %v4424_v0  ;;  %460 = vst.msk [vmem:[#allocation2 + $0x58] sm:$0xff] %vm448_vm0, %v4424_v0  ;;  %s400_s19 = scalar_lea.vmem %s5685_s0, %s3682_s15  ;;  %s4600_s8 = scalar_lea.vmem %s5692_s7, %s3703_s20 }
  0x15   : > { %461 = vst.msk [vmem:[#allocation2 + $0x60] sm:$0xff] %vm448_vm0, %v4424_v0  ;;  %462 = vst.msk [vmem:[#allocation2 + $0x68] sm:$0xff] %vm448_vm0, %v4424_v0  ;;  %s405_s21 = scalar_select %p404_p7, %s3684_s9, 0  ;;  %v3815_v1 = vld [vmem:[%s400_s19] sm:$0xff]   ;;  %v3854_v2 = vld [vmem:[%s400_s19 + $0x8] sm:$0xff]  }
  0x16   : > { %463 = vst.msk [vmem:[#allocation2 + $0x70] sm:$0xff] %vm448_vm0, %v4424_v0  ;;  %464 = vst.msk [vmem:[#allocation2 + $0x78] sm:$0xff] %vm448_vm0, %v4424_v0  ;;  %v3855_v3 = vld [vmem:[%s400_s19 + $0x10] sm:$0xff]   ;;  %v4574_v4 = vunpack.c.l.bf16 %v3815_v1  ;;  %v4576_v5 = vunpack.c.h.bf16 %v3815_v1  ;;  %v4578_v6 = vunpack.c.l.bf16 %v3854_v2  ;;  %v4580_v7 = vunpack.c.h.bf16 %v3854_v2  ;;  %v3856_v8 = vld [vmem:[%s400_s19 + $0x18] sm:$0xff]   ;;  %s429_s13 = sadd.s32 %s3697_s10, %s4557_s11 }
  0x17   : > { %465 = vst.msk [vmem:[#allocation2 + $0x80] sm:$0xff] %vm448_vm0, %v4424_v0  ;;  %466 = vst.msk [vmem:[#allocation2 + $0x88] sm:$0xff] %vm448_vm0, %v4424_v0  ;;  %s5709_s21 = smov (!%p3685_p8, %s405_s21), 15  ;;  %v4583_v9 = vunpack.c.l.bf16 %v3855_v3  ;;  %v4585_v10 = vunpack.c.h.bf16 %v3855_v3  ;;  %v4587_v11 = vunpack.c.l.bf16 %v3856_v8  ;;  %v4589_v12 = vunpack.c.h.bf16 %v3856_v8  ;;  %v3857_v13 = vld [vmem:[%s400_s19 + $0x20] sm:$0xff]   ;;  %v3858_v14 = vld [vmem:[%s400_s19 + $0x28] sm:$0xff]   ;;  %s4635_s16 = sshll.u32 %s429_s13, 2 }
  0x18   : > { %467 = vst.msk [vmem:[#allocation2 + $0x90] sm:$0xff] %vm448_vm0, %v4424_v0  ;;  %468 = vst.msk [vmem:[#allocation2 + $0x98] sm:$0xff] %vm448_vm0, %v4424_v0  ;;  %v3859_v15 = vld [vmem:[%s400_s19 + $0x30] sm:$0xff]   ;;  %v506_v16 = vmax.f32 %v4574_v4, 0.0  ;;  %v507_v17 = vmax.f32 %v4576_v5, 0.0  ;;  %v508_v18 = vmax.f32 %v4578_v6, 0.0  ;;  %v4611_v25 = vunpack.c.l.bf16 %v3857_v13 }
  0x19   : > { %469 = vst.msk [vmem:[#allocation2 + $0xa0] sm:$0xff] %vm448_vm0, %v4424_v0  ;;  %470 = vst.msk [vmem:[#allocation2 + $0xa8] sm:$0xff] %vm448_vm0, %v4424_v0  ;;  %v509_v19 = vmax.f32 %v4580_v7, 0.0  ;;  %v3860_v20 = vld [vmem:[%s400_s19 + $0x38] sm:$0xff]   ;;  %s3690_s22 = sshll.u32 %s5709_s21, 1  ;;  %v510_v21 = vmax.f32 %v4583_v9, 0.0  ;;  %v4613_v26 = vunpack.c.h.bf16 %v3857_v13  ;;  %v4615_v27 = vunpack.c.l.bf16 %v3858_v14  ;;  %s431_s19 = scalar_lea.vmem %s5687_s2, %s4635_s16 }
  0x1a   : > { %471 = vst.msk [vmem:[#allocation2 + $0xb0] sm:$0xff] %vm448_vm0, %v4424_v0  ;;  %v511_v22 = vmax.f32 %v4585_v10, 0.0  ;;  %v512_v23 = vmax.f32 %v4587_v11, 0.0  ;;  %v513_v24 = vmax.f32 %v4589_v12, 0.0  ;;  %s412_s9 = sadd.s32 %s3690_s22, %s4557_s11  ;;  %522 = vst.msk [vmem:[#allocation2 + $0x13] sm:$0xff] %vm448_vm0, %v506_v16  ;;  %v4617_v28 = vunpack.c.h.bf16 %v3858_v14 }
  0x1b   : > { %523 = vst.msk [vmem:[#allocation2 + $0x1b] sm:$0xff] %vm448_vm0, %v507_v17  ;;  %524 = vst.msk [vmem:[#allocation2 + $0x25] sm:$0xff] %vm448_vm0, %v508_v18  ;;  %s3692_s12 = sshll.u32 %s412_s9, 2  ;;  %v4624_v29 = vunpack.c.l.bf16 %v3859_v15  ;;  %v4626_v30 = vunpack.c.h.bf16 %v3859_v15  ;;  %v4628_v31 = vunpack.c.l.bf16 %v3860_v20  ;;  %v4630_v32 = vunpack.c.h.bf16 %v3860_v20 }
  0x1c   : > { %525 = vst.msk [vmem:[#allocation2 + $0x2d] sm:$0xff] %vm448_vm0, %v509_v19  ;;  %526 = vst.msk [vmem:[#allocation2 + $0x37] sm:$0xff] %vm448_vm0, %v510_v21  ;;  %s414_s11 = scalar_lea.vmem %s5686_s1, %s3692_s12  ;;  %v514_v33 = vmax.f32 %v4611_v25, 0.0  ;;  %v515_v34 = vmax.f32 %v4613_v26, 0.0  ;;  %v516_v35 = vmax.f32 %v4615_v27, 0.0  ;;  %v517_v36 = vmax.f32 %v4617_v28, 0.0 }
  0x1d   : > { %527 = vst.msk [vmem:[#allocation2 + $0x3f] sm:$0xff] %vm448_vm0, %v511_v22  ;;  %528 = vst.msk [vmem:[#allocation2 + $0x49] sm:$0xff] %vm448_vm0, %v512_v23  ;;  %v518_v37 = vmax.f32 %v4624_v29, 0.0  ;;  %v519_v38 = vmax.f32 %v4626_v30, 0.0  ;;  %v520_v39 = vmax.f32 %v4628_v31, 0.0  ;;  %v521_v40 = vmax.f32 %v4630_v32, 0.0 }
  0x1e   : > { %529 = vst.msk [vmem:[#allocation2 + $0x51] sm:$0xff] %vm448_vm0, %v513_v24  ;;  %530 = vst.msk [vmem:[#allocation2 + $0x5b] sm:$0xff] %vm448_vm0, %v514_v33  ;;  %541 = sbr.rel (%p3704_p10) target bundleno = 41 (0x29), region = 52 }
  0x1f   : > { %531 = vst.msk [vmem:[#allocation2 + $0x63] sm:$0xff] %vm448_vm0, %v515_v34  ;;  %532 = vst.msk [vmem:[#allocation2 + $0x6d] sm:$0xff] %vm448_vm0, %v516_v35 }
  0x20   : > { %533 = vst.msk [vmem:[#allocation2 + $0x75] sm:$0xff] %vm448_vm0, %v517_v36  ;;  %534 = vst.msk [vmem:[#allocation2 + $0x7f] sm:$0xff] %vm448_vm0, %v518_v37 }
  0x21   : > { %535 = vst.msk [vmem:[#allocation2 + $0x87] sm:$0xff] %vm448_vm0, %v519_v38  ;;  %536 = vst.msk [vmem:[#allocation2 + $0x91] sm:$0xff] %vm448_vm0, %v520_v39 }
  0x22   : > { %537 = vst.msk [vmem:[#allocation2 + $0x99] sm:$0xff] %vm448_vm0, %v521_v40 }
  0x23   : > { %v3847_v41 = vld [vmem:[%s414_s11] sm:$0xff]  }
  0x24   : > { %v3848_v42 = vunpack.c.l.bf16 %v3847_v41  ;;  %v3849_v43 = vunpack.c.h.bf16 %v3847_v41 }
  0x26   : > { %v546_v44 = vmax.f32 %v3848_v42, 0.0  ;;  %v547_v45 = vmax.f32 %v3849_v43, 0.0 }
  0x28   : > { %548 = vst.msk [vmem:[#allocation2 + $0x1] sm:$0xff] %vm448_vm0, %v546_v44  ;;  %549 = vst.msk [vmem:[#allocation2 + $0x9] sm:$0xff] %vm448_vm0, %v547_v45 }
  0x29 PF: > { %p3705_p11 = scmp.ge.s32.totalorder %s4406_s24, 1 }
  0x2b   : > { %553 = sbr.rel (%p3705_p11) target bundleno = 54 (0x36), region = 56 }
  0x30   : > { %v3851_v46 = vld [vmem:[%s431_s19] sm:$0xff]  }
  0x31   : > { %v3852_v47 = vunpack.c.l.bf16 %v3851_v46  ;;  %v3853_v48 = vunpack.c.h.bf16 %v3851_v46 }
  0x33   : > { %v558_v49 = vmax.f32 %v3852_v47, 0.0  ;;  %v559_v50 = vmax.f32 %v3853_v48, 0.0 }
  0x35   : > { %560 = vst.msk [vmem:[#allocation2 + $0xa3] sm:$0xff] %vm448_vm0, %v558_v49  ;;  %561 = vst.msk [vmem:[#allocation2 + $0xab] sm:$0xff] %vm448_vm0, %v559_v50 }
  0x36 PF: > { %3961 = vmatprep.subr.bf16.mxu0 %v4424_v0  ;;  %3999 = vmatprep.subr.bf16.mxu1 %v4424_v0  ;;  %v3706_v51 = vld [vmem:[%s5688_s3 + $0x2] sm:$0x3]  ;;  %vm646_vm1 = vcmask 1041408   ;;  %v589_v52 = vld [vmem:[%s5688_s3] sm:$0x3]  ;;  %vm4425_vm2 = vmmov 0  }
  0x37   : > { %v648_v53 = vsel %vm646_vm1, %v3706_v51, 0  ;;  %v783_v54 = vsel %vm646_vm1, %v589_v52, 0  ;;  %3963 = vmatprep.mubr.msk.bf16.mxu0 %vm4425_vm2, %v4424_v0  ;;  %4001 = vmatprep.mubr.msk.bf16.mxu1 %vm4425_vm2, %v4424_v0  ;;  %v590_v55 = vld [vmem:[#allocation2 + $0x1] sm:$0xff]  ;;  %v591_v56 = vld [vmem:[#allocation2 + $0x9] sm:$0xff]  ;;  %v592_v63 = vld [vmem:[#allocation2 + $0x11] sm:$0xff]  ;;  %vm2250_vm3 = vcmask 1043456  }
  0x38   : > { %v562_v57 = vld [vmem:[#allocation2] sm:$0xff]  ;;  %3962 = vmatpush3.bf16.msra.mxu0 %v648_v53  ;;  %4000 = vmatpush3.bf16.msra.mxu1 %v783_v54  ;;  %v608_v58 = vpack.c.bf16 %v591_v56, %v590_v55  ;;  %v563_v59 = vld [vmem:[#allocation2 + $0x8] sm:$0xff]  ;;  %v564_v2 = vld [vmem:[#allocation2 + $0x10] sm:$0xff]  ;;  %vm2222_vm4 = vcmask 64512  }
  0x39   : > { %v3725_v60 = vld [vmem:[%s5688_s3 + $0x4] sm:$0x3]  ;;  %v580_v61 = vpack.c.bf16 %v563_v59, %v562_v57  ;;  %4037 = vmatprep.subr.bf16.mxu0 %v4424_v0  ;;  %4075 = vmatprep.subr.bf16.mxu1 %v4424_v0  ;;  %v593_v1 = vld [vmem:[#allocation2 + $0x19] sm:$0xff]  ;;  %v3735_v15 = vld [vmem:[%s5688_s3 + $0x6] sm:$0x3] }
  0x3a   : > { %v947_v62 = vsel %vm646_vm1, %v3725_v60, 0  ;;  %v565_v3 = vld [vmem:[#allocation2 + $0x18] sm:$0xff]  ;;  %v609_v8 = vpack.c.bf16 %v593_v1, %v592_v63  ;;  %v594_v14 = vld [vmem:[#allocation2 + $0x21] sm:$0xff]  ;;  %v595_v16 = vld [vmem:[#allocation2 + $0x29] sm:$0xff]  ;;  %v1129_v19 = vsel %vm646_vm1, %v3735_v15, 0 }
  0x3b   : > { %3964 = vmatmul.mubr.msk.bf16.vlgmr.msra.gmra.mxu0 %vm448_vm0, %v608_v58  ;;  %4002 = vmatmul.mubr.msk.bf16.vlgmr.msra.gmra.mxu1 %vm448_vm0, %v580_v61  ;;  %v581_v13 = vpack.c.bf16 %v565_v3, %v564_v2  ;;  %v566_v17 = vld [vmem:[#allocation2 + $0x20] sm:$0xff]  ;;  %v567_v18 = vld [vmem:[#allocation2 + $0x28] sm:$0xff]  ;;  %v610_v20 = vpack.c.bf16 %v595_v16, %v594_v14  ;;  %v596_v22 = vld [vmem:[#allocation2 + $0x31] sm:$0xff] }
  0x3c   : > { %4038 = vmatpush3.bf16.msra.mxu0 %v947_v62  ;;  %3967 = vmatprep.mubr.msk.bf16.mxu0 %vm4425_vm2, %v4424_v0  ;;  %v582_v21 = vpack.c.bf16 %v567_v18, %v566_v17  ;;  %v597_v23 = vld [vmem:[#allocation2 + $0x39] sm:$0xff]  ;;  %v568_v24 = vld [vmem:[#allocation2 + $0x30] sm:$0xff]  ;;  %v598_v36 = vld [vmem:[#allocation2 + $0x41] sm:$0xff] }
  0x3d   : > { %4005 = vmatprep.mubr.msk.bf16.mxu1 %vm4425_vm2, %v4424_v0  ;;  %4113 = vmatprep.subr.bf16.mxu0 %v4424_v0  ;;  %v569_v33 = vld [vmem:[#allocation2 + $0x38] sm:$0xff]  ;;  %v611_v34 = vpack.c.bf16 %v597_v23, %v596_v22  ;;  %v599_v37 = vld [vmem:[#allocation2 + $0x49] sm:$0xff]  ;;  %v570_v38 = vld [vmem:[#allocation2 + $0x40] sm:$0xff] }
  0x3e   : > { %4076 = vmatpush3.bf16.msra.mxu1 %v1129_v19  ;;  %v583_v35 = vpack.c.bf16 %v569_v33, %v568_v24  ;;  %v571_v39 = vld [vmem:[#allocation2 + $0x48] sm:$0xff]  ;;  %v612_v40 = vpack.c.bf16 %v599_v37, %v598_v36  ;;  %v600_v42 = vld [vmem:[#allocation2 + $0x51] sm:$0xff]  ;;  %v601_v43 = vld [vmem:[#allocation2 + $0x59] sm:$0xff] }
  0x3f   : > { %4151 = vmatprep.subr.bf16.mxu1 %v4424_v0  ;;  %v584_v41 = vpack.c.bf16 %v571_v39, %v570_v38  ;;  %v572_v44 = vld [vmem:[#allocation2 + $0x50] sm:$0xff]  ;;  %v573_v45 = vld [vmem:[#allocation2 + $0x58] sm:$0xff]  ;;  %v613_v46 = vpack.c.bf16 %v601_v43, %v600_v42  ;;  %v602_v48 = vld [vmem:[#allocation2 + $0x61] sm:$0xff] }
  0x40   : > { %v585_v47 = vpack.c.bf16 %v573_v45, %v572_v44  ;;  %v603_v49 = vld [vmem:[#allocation2 + $0x69] sm:$0xff]  ;;  %v574_v50 = vld [vmem:[#allocation2 + $0x60] sm:$0xff]  ;;  %v604_v54 = vld [vmem:[#allocation2 + $0x71] sm:$0xff] }
  0x41   : > { %v575_v51 = vld [vmem:[#allocation2 + $0x68] sm:$0xff]  ;;  %v614_v52 = vpack.c.bf16 %v603_v49, %v602_v48  ;;  %v605_v55 = vld [vmem:[#allocation2 + $0x79] sm:$0xff]  ;;  %v576_v56 = vld [vmem:[#allocation2 + $0x70] sm:$0xff] }
  0x42   : > { %v586_v53 = vpack.c.bf16 %v575_v51, %v574_v50  ;;  %v577_v57 = vld [vmem:[#allocation2 + $0x78] sm:$0xff]  ;;  %v615_v58 = vpack.c.bf16 %v605_v55, %v604_v54  ;;  %v606_v60 = vld [vmem:[#allocation2 + $0x81] sm:$0xff]  ;;  %v607_v61 = vld [vmem:[#allocation2 + $0x89] sm:$0xff] }
  0x43   : > { %3968 = vmatmul.mubr.msk.bf16.gmra.mxu0 %vm448_vm0, %v609_v8  ;;  %4006 = vmatmul.mubr.msk.bf16.gmra.mxu1 %vm448_vm0, %v581_v13  ;;  %v587_v59 = vpack.c.bf16 %v577_v57, %v576_v56  ;;  %v578_v62 = vld [vmem:[#allocation2 + $0x80] sm:$0xff]  ;;  %v579_v63 = vld [vmem:[#allocation2 + $0x88] sm:$0xff]  ;;  %v616_v1 = vpack.c.bf16 %v607_v61, %v606_v60  ;;  %v1072_v13 = vld [vmem:[#allocation2 + $0x12] sm:$0xff] }
  0x44   : > { %3971 = vmatprep.mubr.msk.bf16.mxu0 %vm4425_vm2, %v4424_v0  ;;  %4009 = vmatprep.mubr.msk.bf16.mxu1 %vm4425_vm2, %v4424_v0  ;;  %v588_v2 = vpack.c.bf16 %v579_v63, %v578_v62  ;;  %v890_v3 = vld [vmem:[#allocation2 + $0x2] sm:$0xff]  ;;  %v891_v8 = vld [vmem:[#allocation2 + $0xa] sm:$0xff]  ;;  %v1073_v14 = vld [vmem:[#allocation2 + $0x1a] sm:$0xff] }
  0x45   : > { %v3745_v15 = vld [vmem:[%s5688_s3 + $0x8] sm:$0x3]  ;;  %v908_v16 = vpack.c.bf16 %v891_v8, %v890_v3  ;;  %v1090_v17 = vpack.c.bf16 %v1073_v14, %v1072_v13  ;;  %v3755_v18 = vld [vmem:[%s5688_s3 + $0xa] sm:$0x3]  ;;  %v1076_v24 = vld [vmem:[#allocation2 + $0x32] sm:$0xff] }
  0x46   : > { %v1311_v19 = vsel %vm646_vm1, %v3745_v15, 0  ;;  %v1075_v22 = vld [vmem:[#allocation2 + $0x2a] sm:$0xff]  ;;  %v1077_v33 = vld [vmem:[#allocation2 + $0x3a] sm:$0xff]  ;;  %v1080_v38 = vld [vmem:[#allocation2 + $0x52] sm:$0xff] }
  0x47   : > { %v1079_v36 = vld [vmem:[#allocation2 + $0x4a] sm:$0xff]  ;;  %v1081_v39 = vld [vmem:[#allocation2 + $0x5a] sm:$0xff]  ;;  %v1084_v44 = vld [vmem:[#allocation2 + $0x72] sm:$0xff] }
  0x48   : > { %v1083_v42 = vld [vmem:[#allocation2 + $0x6a] sm:$0xff]  ;;  %v1085_v45 = vld [vmem:[#allocation2 + $0x7a] sm:$0xff]  ;;  %v1088_v50 = vld [vmem:[#allocation2 + $0x92] sm:$0xff] }
  0x49   : > { %v1087_v48 = vld [vmem:[#allocation2 + $0x8a] sm:$0xff]  ;;  %v1089_v51 = vld [vmem:[#allocation2 + $0x9a] sm:$0xff] }
  0x4a   : > { %v1255_v54 = vld [vmem:[#allocation2 + $0x1b] sm:$0xff]  ;;  %v3765_v57 = vld [vmem:[%s5688_s3 + $0xc] sm:$0x3]  ;;  %v3775_v60 = vld [vmem:[%s5688_s3 + $0xe] sm:$0x3] }
  0x4b   : > { %3972 = vmatmul.mubr.msk.bf16.gmra.mxu0 %vm448_vm0, %v610_v20  ;;  %4010 = vmatmul.mubr.msk.bf16.gmra.mxu1 %vm448_vm0, %v582_v21  ;;  %v1493_v20 = vsel %vm646_vm1, %v3755_v18, 0  ;;  %v1074_v21 = vld [vmem:[#allocation2 + $0x22] sm:$0xff]  ;;  %v1436_v55 = vld [vmem:[#allocation2 + $0x14] sm:$0xff]  ;;  %v1675_v61 = vsel %vm646_vm1, %v3765_v57, 0  ;;  %v1857_v62 = vsel %vm646_vm1, %v3775_v60, 0  ;;  %v1439_v3 = vld [vmem:[#allocation2 + $0x2c] sm:$0xff] }
  0x4c   : > { %3975 = vmatprep.mubr.msk.bf16.mxu0 %vm4425_vm2, %v4424_v0  ;;  %4013 = vmatprep.mubr.msk.bf16.mxu1 %vm4425_vm2, %v4424_v0  ;;  %v1091_v23 = vpack.c.bf16 %v1075_v22, %v1074_v21  ;;  %v1437_v56 = vld [vmem:[#allocation2 + $0x1c] sm:$0xff]  ;;  %v1258_v14 = vld [vmem:[#allocation2 + $0x33] sm:$0xff]  ;;  %v1261_v21 = vld [vmem:[#allocation2 + $0x4b] sm:$0xff] }
  0x4d   : > { %v1256_v63 = vld [vmem:[#allocation2 + $0x23] sm:$0xff]  ;;  %v1259_v15 = vld [vmem:[#allocation2 + $0x3b] sm:$0xff] }
  0x4e   : > { %v1274_v18 = vpack.c.bf16 %v1259_v15, %v1258_v14  ;;  %v1442_v22 = vld [vmem:[#allocation2 + $0x44] sm:$0xff] }
  0x4f   : > { %v1450_v57 = vld [vmem:[#allocation2 + $0x84] sm:$0xff] }
  0x53   : > { %3976 = vmatmul.mubr.msk.bf16.gmra.mxu0 %vm448_vm0, %v611_v34  ;;  %4014 = vmatmul.mubr.msk.bf16.gmra.mxu1 %vm448_vm0, %v583_v35  ;;  %v1092_v34 = vpack.c.bf16 %v1077_v33, %v1076_v24  ;;  %v1078_v35 = vld [vmem:[#allocation2 + $0x42] sm:$0xff] }
  0x54   : > { %3979 = vmatprep.mubr.msk.bf16.mxu0 %vm4425_vm2, %v4424_v0  ;;  %4017 = vmatprep.mubr.msk.bf16.mxu1 %vm4425_vm2, %v4424_v0  ;;  %v1093_v37 = vpack.c.bf16 %v1079_v36, %v1078_v35  ;;  %v1263_v35 = vld [vmem:[#allocation2 + $0x5b] sm:$0xff] }
  0x55   : > { %v1444_v36 = vld [vmem:[#allocation2 + $0x54] sm:$0xff] }
  0x5b   : > { %3980 = vmatmul.mubr.msk.bf16.gmra.mxu0 %vm448_vm0, %v612_v40  ;;  %4018 = vmatmul.mubr.msk.bf16.gmra.mxu1 %vm448_vm0, %v584_v41  ;;  %v1094_v40 = vpack.c.bf16 %v1081_v39, %v1080_v38  ;;  %v1082_v41 = vld [vmem:[#allocation2 + $0x62] sm:$0xff] }
  0x5c   : > { %3983 = vmatprep.mubr.msk.bf16.mxu0 %vm4425_vm2, %v4424_v0  ;;  %4021 = vmatprep.mubr.msk.bf16.mxu1 %vm4425_vm2, %v4424_v0  ;;  %v1095_v43 = vpack.c.bf16 %v1083_v42, %v1082_v41  ;;  %v1265_v41 = vld [vmem:[#allocation2 + $0x6b] sm:$0xff] }
  0x5d   : > { %v1446_v42 = vld [vmem:[#allocation2 + $0x64] sm:$0xff] }
  0x63   : > { %3984 = vmatmul.mubr.msk.bf16.gmra.mxu0 %vm448_vm0, %v613_v46  ;;  %4022 = vmatmul.mubr.msk.bf16.gmra.mxu1 %vm448_vm0, %v585_v47  ;;  %v1096_v46 = vpack.c.bf16 %v1085_v45, %v1084_v44  ;;  %v1086_v47 = vld [vmem:[#allocation2 + $0x82] sm:$0xff] }
  0x64   : > { %3987 = vmatprep.mubr.msk.bf16.mxu0 %vm4425_vm2, %v4424_v0  ;;  %4025 = vmatprep.mubr.msk.bf16.mxu1 %vm4425_vm2, %v4424_v0  ;;  %v1097_v49 = vpack.c.bf16 %v1087_v48, %v1086_v47  ;;  %v1267_v47 = vld [vmem:[#allocation2 + $0x7b] sm:$0xff] }
  0x65   : > { %v1448_v48 = vld [vmem:[#allocation2 + $0x74] sm:$0xff] }
  0x6b   : > { %3988 = vmatmul.mubr.msk.bf16.gmra.mxu0 %vm448_vm0, %v614_v52  ;;  %4026 = vmatmul.mubr.msk.bf16.gmra.mxu1 %vm448_vm0, %v586_v53  ;;  %v1098_v52 = vpack.c.bf16 %v1089_v51, %v1088_v50  ;;  %v1254_v53 = vld [vmem:[#allocation2 + $0x13] sm:$0xff] }
  0x6c   : > { %3991 = vmatprep.mubr.msk.bf16.mxu0 %vm4425_vm2, %v4424_v0  ;;  %4029 = vmatprep.mubr.msk.bf16.mxu1 %vm4425_vm2, %v4424_v0 }
  0x73   : > { %3992 = vmatmul.mubr.msk.bf16.gmra.mxu0 %vm448_vm0, %v615_v58  ;;  %4030 = vmatmul.mubr.msk.bf16.gmra.mxu1 %vm448_vm0, %v587_v59  ;;  %v1272_v58 = vpack.c.bf16 %v1255_v54, %v1254_v53  ;;  %v1454_v59 = vpack.c.bf16 %v1437_v56, %v1436_v55  ;;  %v1268_v54 = vld [vmem:[#allocation2 + $0x83] sm:$0xff]  ;;  %v1269_v56 = vld [vmem:[#allocation2 + $0x8b] sm:$0xff] }
  0x74   : > { %3995 = vmatprep.mubr.msk.bf16.mxu0 %vm4425_vm2, %v4424_v0  ;;  %4033 = vmatprep.mubr.msk.bf16.mxu1 %vm4425_vm2, %v4424_v0 }
  0x7b   : > { %3996 = vmatmul.mubr.msk.bf16.gmra.mxu0 %vm448_vm0, %v616_v1  ;;  %4034 = vmatmul.mubr.msk.bf16.gmra.mxu1 %vm448_vm0, %v588_v2  ;;  %v1257_v1 = vld [vmem:[#allocation2 + $0x2b] sm:$0xff] }
  0x7c   : > { %4039 = vmatprep.mubr.msk.bf16.mxu0 %vm4425_vm2, %v4424_v0  ;;  %4077 = vmatprep.mubr.msk.bf16.mxu1 %vm4425_vm2, %v4424_v0  ;;  %v1438_v2 = vld [vmem:[#allocation2 + $0x24] sm:$0xff]  ;;  %v1273_v8 = vpack.c.bf16 %v1257_v1, %v1256_v63  ;;  %v1279_v63 = vpack.c.bf16 %v1269_v56, %v1268_v54 }
  0x7d   : > { %v4823_v13 = vpack.c.bf16 %v1439_v3, %v1438_v2 }
  0x83   : > { %4040 = vmatmul.mubr.msk.bf16.vlgmr.msra.gmra.mxu0 %vm448_vm0, %v908_v16  ;;  %4078 = vmatmul.mubr.msk.bf16.vlgmr.msra.gmra.mxu1 %vm448_vm0, %v1090_v17  ;;  %v1440_v16 = vld [vmem:[#allocation2 + $0x34] sm:$0xff] }
  0x84   : > { %4114 = vmatpush3.bf16.msra.mxu0 %v1311_v19  ;;  %4043 = vmatprep.mubr.msk.bf16.mxu0 %vm4425_vm2, %v4424_v0 }
  0x85   : > { %4081 = vmatprep.mubr.msk.bf16.mxu1 %vm4425_vm2, %v4424_v0  ;;  %4152 = vmatpush3.bf16.msra.mxu1 %v1493_v20  ;;  %v1260_v20 = vld [vmem:[#allocation2 + $0x43] sm:$0xff] }
  0x86   : > { %4189 = vmatprep.subr.bf16.mxu0 %v4424_v0  ;;  %4227 = vmatprep.subr.bf16.mxu1 %v4424_v0  ;;  %v1275_v24 = vpack.c.bf16 %v1261_v21, %v1260_v20  ;;  %v1452_v20 = vld [vmem:[#allocation2 + $0x94] sm:$0xff]  ;;  %v1453_v21 = vld [vmem:[#allocation2 + $0x9c] sm:$0xff] }
  0x8b   : > { %4044 = vmatmul.mubr.msk.bf16.gmra.mxu0 %vm448_vm0, %v1090_v17  ;;  %4082 = vmatmul.mubr.msk.bf16.gmra.mxu1 %vm448_vm0, %v1091_v23  ;;  %v1441_v17 = vld [vmem:[#allocation2 + $0x3c] sm:$0xff] }
  0x8c   : > { %4047 = vmatprep.mubr.msk.bf16.mxu0 %vm4425_vm2, %v4424_v0  ;;  %4085 = vmatprep.mubr.msk.bf16.mxu1 %vm4425_vm2, %v4424_v0  ;;  %v4832_v19 = vpack.c.bf16 %v1441_v17, %v1440_v16  ;;  %v1270_v16 = vld [vmem:[#allocation2 + $0x93] sm:$0xff] }
  0x93   : > { %4048 = vmatmul.mubr.msk.bf16.gmra.mxu0 %vm448_vm0, %v1091_v23  ;;  %4086 = vmatmul.mubr.msk.bf16.gmra.mxu1 %vm448_vm0, %v1092_v34  ;;  %v1443_v23 = vld [vmem:[#allocation2 + $0x4c] sm:$0xff] }
  0x94   : > { %4051 = vmatprep.mubr.msk.bf16.mxu0 %vm4425_vm2, %v4424_v0  ;;  %4089 = vmatprep.mubr.msk.bf16.mxu1 %vm4425_vm2, %v4424_v0  ;;  %v4841_v33 = vpack.c.bf16 %v1443_v23, %v1442_v22 }
  0x9b   : > { %4052 = vmatmul.mubr.msk.bf16.gmra.mxu0 %vm448_vm0, %v1092_v34  ;;  %4090 = vmatmul.mubr.msk.bf16.gmra.mxu1 %vm448_vm0, %v1093_v37  ;;  %v1262_v34 = vld [vmem:[#allocation2 + $0x53] sm:$0xff] }
  0x9c   : > { %4055 = vmatprep.mubr.msk.bf16.mxu0 %vm4425_vm2, %v4424_v0  ;;  %4093 = vmatprep.mubr.msk.bf16.mxu1 %vm4425_vm2, %v4424_v0  ;;  %v1276_v38 = vpack.c.bf16 %v1263_v35, %v1262_v34 }
  0xa3   : > { %4056 = vmatmul.mubr.msk.bf16.gmra.mxu0 %vm448_vm0, %v1093_v37  ;;  %4094 = vmatmul.mubr.msk.bf16.gmra.mxu1 %vm448_vm0, %v1094_v40  ;;  %v1445_v37 = vld [vmem:[#allocation2 + $0x5c] sm:$0xff] }
  0xa4   : > { %4059 = vmatprep.mubr.msk.bf16.mxu0 %vm4425_vm2, %v4424_v0  ;;  %4097 = vmatprep.mubr.msk.bf16.mxu1 %vm4425_vm2, %v4424_v0  ;;  %v4850_v39 = vpack.c.bf16 %v1445_v37, %v1444_v36  ;;  %v4892_v36 = vpack.c.bf16 %v1453_v21, %v1452_v20 }
  0xab   : > { %4060 = vmatmul.mubr.msk.bf16.gmra.mxu0 %vm448_vm0, %v1094_v40  ;;  %4098 = vmatmul.mubr.msk.bf16.gmra.mxu1 %vm448_vm0, %v1095_v43  ;;  %v1264_v40 = vld [vmem:[#allocation2 + $0x63] sm:$0xff] }
  0xac   : > { %4063 = vmatprep.mubr.msk.bf16.mxu0 %vm4425_vm2, %v4424_v0  ;;  %4101 = vmatprep.mubr.msk.bf16.mxu1 %vm4425_vm2, %v4424_v0  ;;  %v1277_v44 = vpack.c.bf16 %v1265_v41, %v1264_v40 }
  0xb3   : > { %4064 = vmatmul.mubr.msk.bf16.gmra.mxu0 %vm448_vm0, %v1095_v43  ;;  %4102 = vmatmul.mubr.msk.bf16.gmra.mxu1 %vm448_vm0, %v1096_v46  ;;  %v1447_v43 = vld [vmem:[#allocation2 + $0x6c] sm:$0xff] }
  0xb4   : > { %4067 = vmatprep.mubr.msk.bf16.mxu0 %vm4425_vm2, %v4424_v0  ;;  %4105 = vmatprep.mubr.msk.bf16.mxu1 %vm4425_vm2, %v4424_v0  ;;  %v4859_v45 = vpack.c.bf16 %v1447_v43, %v1446_v42 }
  0xbb   : > { %4068 = vmatmul.mubr.msk.bf16.gmra.mxu0 %vm448_vm0, %v1096_v46  ;;  %4106 = vmatmul.mubr.msk.bf16.gmra.mxu1 %vm448_vm0, %v1097_v49  ;;  %v1266_v46 = vld [vmem:[#allocation2 + $0x73] sm:$0xff] }
  0xbc   : > { %4071 = vmatprep.mubr.msk.bf16.mxu0 %vm4425_vm2, %v4424_v0  ;;  %4109 = vmatprep.mubr.msk.bf16.mxu1 %vm4425_vm2, %v4424_v0  ;;  %v1278_v50 = vpack.c.bf16 %v1267_v47, %v1266_v46  ;;  %v1801_v46 = vld [vmem:[#allocation2 + $0x2d] sm:$0xff] }
  0xc3   : > { %4072 = vmatmul.mubr.msk.bf16.gmra.mxu0 %vm448_vm0, %v1097_v49  ;;  %4110 = vmatmul.mubr.msk.bf16.gmra.mxu1 %vm448_vm0, %v1098_v52  ;;  %v1449_v49 = vld [vmem:[#allocation2 + $0x7c] sm:$0xff] }
  0xc4   : > { %4115 = vmatprep.mubr.msk.bf16.mxu0 %vm4425_vm2, %v4424_v0  ;;  %4153 = vmatprep.mubr.msk.bf16.mxu1 %vm4425_vm2, %v4424_v0  ;;  %v4868_v51 = vpack.c.bf16 %v1449_v49, %v1448_v48  ;;  %v3785_v49 = vld [vmem:[%s5688_s3 + $0x10] sm:$0x3] }
  0xcb   : > { %4116 = vmatmul.mubr.msk.bf16.vlgmr.msra.gmra.mxu0 %vm448_vm0, %v1272_v58  ;;  %4154 = vmatmul.mubr.msk.bf16.vlgmr.msra.gmra.mxu1 %vm448_vm0, %v1454_v59  ;;  %v1451_v58 = vld [vmem:[#allocation2 + $0x8c] sm:$0xff] }
  0xcc   : > { %4190 = vmatpush3.bf16.msra.mxu0 %v1675_v61  ;;  %4119 = vmatprep.mubr.msk.bf16.mxu0 %vm4425_vm2, %v4424_v0  ;;  %v4879_v1 = vpack.c.bf16 %v1451_v58, %v1450_v57  ;;  %v2039_v58 = vsel %vm646_vm1, %v3785_v49, 0 }
  0xcd   : > { %4157 = vmatprep.mubr.msk.bf16.mxu1 %vm4425_vm2, %v4424_v0  ;;  %4228 = vmatpush3.bf16.msra.mxu1 %v1857_v62 }
  0xce   : > { %4265 = vmatprep.subr.bf16.mxu0 %v4424_v0  ;;  %4303 = vmatprep.subr.bf16.mxu1 %v4424_v0 }
  0xd3   : > { %4120 = vmatmul.mubr.msk.bf16.gmra.mxu0 %vm448_vm0, %v1273_v8  ;;  %4158 = vmatmul.mubr.msk.bf16.gmra.mxu1 %vm448_vm0, %v4823_v13 }
  0xd4   : > { %4123 = vmatprep.mubr.msk.bf16.mxu0 %vm4425_vm2, %v4424_v0  ;;  %4161 = vmatprep.mubr.msk.bf16.mxu1 %vm4425_vm2, %v4424_v0 }
  0xdb   : > { %4124 = vmatmul.mubr.msk.bf16.gmra.mxu0 %vm448_vm0, %v1274_v18  ;;  %4162 = vmatmul.mubr.msk.bf16.gmra.mxu1 %vm448_vm0, %v4832_v19  ;;  %v1271_v18 = vld [vmem:[#allocation2 + $0x9b] sm:$0xff] }
  0xdc   : > { %4127 = vmatprep.mubr.msk.bf16.mxu0 %vm4425_vm2, %v4424_v0  ;;  %4165 = vmatprep.mubr.msk.bf16.mxu1 %vm4425_vm2, %v4424_v0  ;;  %v1280_v35 = vpack.c.bf16 %v1271_v18, %v1270_v16 }
  0xe3   : > { %4128 = vmatmul.mubr.msk.bf16.gmra.mxu0 %vm448_vm0, %v1275_v24  ;;  %4166 = vmatmul.mubr.msk.bf16.gmra.mxu1 %vm448_vm0, %v4841_v33 }
  0xe4   : > { %4131 = vmatprep.mubr.msk.bf16.mxu0 %vm4425_vm2, %v4424_v0  ;;  %4169 = vmatprep.mubr.msk.bf16.mxu1 %vm4425_vm2, %v4424_v0 }
  0xeb   : > { %4132 = vmatmul.mubr.msk.bf16.gmra.mxu0 %vm448_vm0, %v1276_v38  ;;  %4170 = vmatmul.mubr.msk.bf16.gmra.mxu1 %vm448_vm0, %v4850_v39 }
  0xec   : > { %4135 = vmatprep.mubr.msk.bf16.mxu0 %vm4425_vm2, %v4424_v0  ;;  %4173 = vmatprep.mubr.msk.bf16.mxu1 %vm4425_vm2, %v4424_v0 }
  0xf3   : > { %4136 = vmatmul.mubr.msk.bf16.gmra.mxu0 %vm448_vm0, %v1277_v44  ;;  %4174 = vmatmul.mubr.msk.bf16.gmra.mxu1 %vm448_vm0, %v4859_v45  ;;  %v1800_v44 = vld [vmem:[#allocation2 + $0x25] sm:$0xff] }
  0xf4   : > { %4139 = vmatprep.mubr.msk.bf16.mxu0 %vm4425_vm2, %v4424_v0  ;;  %4177 = vmatprep.mubr.msk.bf16.mxu1 %vm4425_vm2, %v4424_v0 }
  0xfb   : > { %v684_v52 = vpop.f32.mrf.mxu0  ;;  %v819_v53 = vpop.f32.mrf.mxu1  ;;  %4140 = vmatmul.mubr.msk.bf16.gmra.mxu0 %vm448_vm0, %v1278_v50  ;;  %4178 = vmatmul.mubr.msk.bf16.gmra.mxu1 %vm448_vm0, %v4868_v51 }
  0xfc   : > { %v4873_v55 = vadd.f32 %v819_v53, %v684_v52  ;;  %4143 = vmatprep.mubr.msk.bf16.mxu0 %vm4425_vm2, %v4424_v0  ;;  %4181 = vmatprep.mubr.msk.bf16.mxu1 %vm4425_vm2, %v4424_v0  ;;  %v1818_v53 = vpack.c.bf16 %v1801_v46, %v1800_v44 }
  0xfd   : > { %v3965_v59 = vpop.f32.mrf.mxu0  ;;  %v4003_v60 = vpop.f32.mrf.mxu1 }
  0xff   : > { %v687_v61 = vpop.f32.mrf.mxu0  ;;  %v822_v62 = vpop.f32.mrf.mxu1 }
 0x100   : > { %v4881_v2 = vadd.f32 %v822_v62, %v687_v61  ;;  %v1802_v62 = vld [vmem:[#allocation2 + $0x35] sm:$0xff] }
 0x101   : > { %v3966_v3 = vpop.f32.mrf.mxu0  ;;  %v4004_v8 = vpop.f32.mrf.mxu1 }
 0x103   : > { %v692_v14 = vpop.f32.mrf.mxu0  ;;  %v827_v15 = vpop.f32.mrf.mxu1  ;;  %4144 = vmatmul.mubr.msk.bf16.gmra.mxu0 %vm448_vm0, %v1279_v63  ;;  %4182 = vmatmul.mubr.msk.bf16.gmra.mxu1 %vm448_vm0, %v4879_v1  ;;  %v1803_v63 = vld [vmem:[#allocation2 + $0x3d] sm:$0xff] }
 0x104   : > { %v4886_v17 = vadd.f32 %v827_v15, %v692_v14  ;;  %4147 = vmatprep.mubr.msk.bf16.mxu0 %vm4425_vm2, %v4424_v0  ;;  %4185 = vmatprep.mubr.msk.bf16.mxu1 %vm4425_vm2, %v4424_v0  ;;  %v1819_v16 = vpack.c.bf16 %v1803_v63, %v1802_v62 }
 0x105   : > { %v3969_v22 = vpop.f32.mrf.mxu0  ;;  %v4007_v23 = vpop.f32.mrf.mxu1 }
 0x107   : > { %v695_v24 = vpop.f32.mrf.mxu0  ;;  %v830_v34 = vpop.f32.mrf.mxu1 }
 0x108   : > { %v4894_v37 = vadd.f32 %v830_v34, %v695_v24  ;;  %v1804_v24 = vld [vmem:[#allocation2 + $0x45] sm:$0xff]  ;;  %v1805_v34 = vld [vmem:[#allocation2 + $0x4d] sm:$0xff] }
 0x109   : > { %v3970_v38 = vpop.f32.mrf.mxu0  ;;  %v4008_v40 = vpop.f32.mrf.mxu1 }
 0x10b   : > { %v700_v41 = vpop.f32.mrf.mxu0  ;;  %v835_v42 = vpop.f32.mrf.mxu1  ;;  %4148 = vmatmul.mubr.msk.bf16.gmra.mxu0 %vm448_vm0, %v1280_v35  ;;  %4186 = vmatmul.mubr.msk.bf16.gmra.mxu1 %vm448_vm0, %v4892_v36 }
 0x10c   : > { %v4899_v43 = vadd.f32 %v835_v42, %v700_v41  ;;  %4191 = vmatprep.mubr.msk.bf16.mxu0 %vm4425_vm2, %v4424_v0  ;;  %4229 = vmatprep.mubr.msk.bf16.mxu1 %vm4425_vm2, %v4424_v0  ;;  %v1820_v42 = vpack.c.bf16 %v1805_v34, %v1804_v24 }
 0x10d   : > { %v3973_v47 = vpop.f32.mrf.mxu0  ;;  %v4011_v48 = vpop.f32.mrf.mxu1 }
 0x10f   : > { %v703_v50 = vpop.f32.mrf.mxu0  ;;  %v838_v52 = vpop.f32.mrf.mxu1 }
 0x110   : > { %v4908_v54 = vadd.f32 %v838_v52, %v703_v50  ;;  %v1806_v50 = vld [vmem:[#allocation2 + $0x55] sm:$0xff]  ;;  %v1807_v52 = vld [vmem:[#allocation2 + $0x5d] sm:$0xff] }
 0x111   : > { %v3974_v56 = vpop.f32.mrf.mxu0  ;;  %v4012_v57 = vpop.f32.mrf.mxu1 }
 0x113   : > { %v708_v59 = vpop.f32.mrf.mxu0  ;;  %v843_v60 = vpop.f32.mrf.mxu1  ;;  %4192 = vmatmul.mubr.msk.bf16.vlgmr.msra.gmra.mxu0 %vm448_vm0, %v4823_v13  ;;  %4230 = vmatmul.mubr.msk.bf16.vlgmr.msra.gmra.mxu1 %vm448_vm0, %v1818_v53 }
 0x114   : > { %v4914_v61 = vadd.f32 %v843_v60, %v708_v59  ;;  %4266 = vmatpush3.bf16.msra.mxu0 %v2039_v58  ;;  %4195 = vmatprep.mubr.msk.bf16.mxu0 %vm4425_vm2, %v4424_v0  ;;  %v1821_v59 = vpack.c.bf16 %v1807_v52, %v1806_v50 }
 0x115   : > { %v3977_v3 = vpop.f32.mrf.mxu0  ;;  %v4015_v8 = vpop.f32.mrf.mxu1  ;;  %4233 = vmatprep.mubr.msk.bf16.mxu1 %vm4425_vm2, %v4424_v0 }
 0x117   : > { %v711_v14 = vpop.f32.mrf.mxu0  ;;  %v846_v15 = vpop.f32.mrf.mxu1 }
 0x118   : > { %v4920_v18 = vadd.f32 %v846_v15, %v711_v14  ;;  %v1808_v14 = vld [vmem:[#allocation2 + $0x65] sm:$0xff]  ;;  %v1809_v15 = vld [vmem:[#allocation2 + $0x6d] sm:$0xff] }
 0x119   : > { %v3978_v13 = vpop.f32.mrf.mxu0  ;;  %v4016_v20 = vpop.f32.mrf.mxu1 }
 0x11b   : > { %v716_v21 = vpop.f32.mrf.mxu0  ;;  %v851_v22 = vpop.f32.mrf.mxu1  ;;  %4196 = vmatmul.mubr.msk.bf16.gmra.mxu0 %vm448_vm0, %v4832_v19  ;;  %4234 = vmatmul.mubr.msk.bf16.gmra.mxu1 %vm448_vm0, %v1819_v16 }
 0x11c   : > { %v4925_v23 = vadd.f32 %v851_v22, %v716_v21  ;;  %4199 = vmatprep.mubr.msk.bf16.mxu0 %vm4425_vm2, %v4424_v0  ;;  %4237 = vmatprep.mubr.msk.bf16.mxu1 %vm4425_vm2, %v4424_v0  ;;  %v1822_v22 = vpack.c.bf16 %v1809_v15, %v1808_v14 }
 0x11d   : > { %v3981_v35 = vpop.f32.mrf.mxu0  ;;  %v4019_v38 = vpop.f32.mrf.mxu1 }
 0x11f   : > { %v719_v40 = vpop.f32.mrf.mxu0  ;;  %v854_v41 = vpop.f32.mrf.mxu1 }
 0x120   : > { %v4931_v44 = vadd.f32 %v854_v41, %v719_v40  ;;  %v1810_v41 = vld [vmem:[#allocation2 + $0x75] sm:$0xff] }
 0x121   : > { %v3982_v19 = vpop.f32.mrf.mxu0  ;;  %v4020_v46 = vpop.f32.mrf.mxu1 }
 0x123   : > { %v724_v47 = vpop.f32.mrf.mxu0  ;;  %v859_v48 = vpop.f32.mrf.mxu1  ;;  %4200 = vmatmul.mubr.msk.bf16.gmra.mxu0 %vm448_vm0, %v4841_v33  ;;  %4238 = vmatmul.mubr.msk.bf16.gmra.mxu1 %vm448_vm0, %v1820_v42  ;;  %v1811_v42 = vld [vmem:[#allocation2 + $0x7d] sm:$0xff] }
 0x124   : > { %v4936_v49 = vadd.f32 %v859_v48, %v724_v47  ;;  %4203 = vmatprep.mubr.msk.bf16.mxu0 %vm4425_vm2, %v4424_v0  ;;  %4241 = vmatprep.mubr.msk.bf16.mxu1 %vm4425_vm2, %v4424_v0  ;;  %v1823_v50 = vpack.c.bf16 %v1811_v42, %v1810_v41 }
 0x125   : > { %v3985_v53 = vpop.f32.mrf.mxu0  ;;  %v4023_v56 = vpop.f32.mrf.mxu1 }
 0x127   : > { %v727_v57 = vpop.f32.mrf.mxu0  ;;  %v862_v58 = vpop.f32.mrf.mxu1 }
 0x128   : > { %v4942_v60 = vadd.f32 %v862_v58, %v727_v57 }
 0x129   : > { %v3986_v33 = vpop.f32.mrf.mxu0  ;;  %v4024_v62 = vpop.f32.mrf.mxu1 }
 0x12a   : > { %v1813_v33 = vld [vmem:[#allocation2 + $0x8d] sm:$0xff] }
 0x12b   : > { %v732_v63 = vpop.f32.mrf.mxu0  ;;  %v867_v3 = vpop.f32.mrf.mxu1  ;;  %4204 = vmatmul.mubr.msk.bf16.gmra.mxu0 %vm448_vm0, %v4850_v39  ;;  %4242 = vmatmul.mubr.msk.bf16.gmra.mxu1 %vm448_vm0, %v1821_v59  ;;  %v1812_v59 = vld [vmem:[#allocation2 + $0x85] sm:$0xff] }
 0x12c   : > { %v4947_v8 = vadd.f32 %v867_v3, %v732_v63  ;;  %4207 = vmatprep.mubr.msk.bf16.mxu0 %vm4425_vm2, %v4424_v0  ;;  %4245 = vmatprep.mubr.msk.bf16.mxu1 %vm4425_vm2, %v4424_v0  ;;  %v1824_v15 = vpack.c.bf16 %v1813_v33, %v1812_v59  ;;  %v1817_v59 = vld [vmem:[#allocation2 + $0xad] sm:$0xff] }
 0x12d   : > { %v3989_v16 = vpop.f32.mrf.mxu0  ;;  %v4027_v13 = vpop.f32.mrf.mxu1 }
 0x12f   : > { %v735_v20 = vpop.f32.mrf.mxu0  ;;  %v870_v21 = vpop.f32.mrf.mxu1 }
 0x130   : > { %v4953_v24 = vadd.f32 %v870_v21, %v735_v20 }
 0x131   : > { %v3990_v39 = vpop.f32.mrf.mxu0  ;;  %v4028_v34 = vpop.f32.mrf.mxu1 }
 0x132   : > { %v1814_v39 = vld [vmem:[#allocation2 + $0x95] sm:$0xff]  ;;  %v1815_v34 = vld [vmem:[#allocation2 + $0x9d] sm:$0xff] }
 0x133   : > { %v740_v35 = vpop.f32.mrf.mxu0  ;;  %v875_v38 = vpop.f32.mrf.mxu1  ;;  %4208 = vmatmul.mubr.msk.bf16.gmra.mxu0 %vm448_vm0, %v4859_v45  ;;  %4246 = vmatmul.mubr.msk.bf16.gmra.mxu1 %vm448_vm0, %v1822_v22 }
 0x134   : > { %v4958_v40 = vadd.f32 %v875_v38, %v740_v35  ;;  %4211 = vmatprep.mubr.msk.bf16.mxu0 %vm4425_vm2, %v4424_v0  ;;  %4249 = vmatprep.mubr.msk.bf16.mxu1 %vm4425_vm2, %v4424_v0 }
 0x135   : > { %v3993_v19 = vpop.f32.mrf.mxu0  ;;  %v4031_v46 = vpop.f32.mrf.mxu1 }
 0x137   : > { %v743_v47 = vpop.f32.mrf.mxu0  ;;  %v878_v48 = vpop.f32.mrf.mxu1 }
 0x138   : > { %v4964_v52 = vadd.f32 %v878_v48, %v743_v47 }
 0x139   : > { %v3994_v45 = vpop.f32.mrf.mxu0  ;;  %v4032_v53 = vpop.f32.mrf.mxu1 }
 0x13a   : > { %v1634_v53 = vld [vmem:[#allocation2 + $0xa4] sm:$0xff] }
 0x13b   : > { %v748_v56 = vpop.f32.mrf.mxu0  ;;  %v883_v57 = vpop.f32.mrf.mxu1  ;;  %4212 = vmatmul.mubr.msk.bf16.gmra.mxu0 %vm448_vm0, %v4868_v51  ;;  %4250 = vmatmul.mubr.msk.bf16.gmra.mxu1 %vm448_vm0, %v1823_v50 }
 0x13c   : > { %v4969_v58 = vadd.f32 %v883_v57, %v748_v56  ;;  %4215 = vmatprep.mubr.msk.bf16.mxu0 %vm4425_vm2, %v4424_v0  ;;  %4253 = vmatprep.mubr.msk.bf16.mxu1 %vm4425_vm2, %v4424_v0  ;;  %v1635_v57 = vld [vmem:[#allocation2 + $0xac] sm:$0xff] }
 0x13d   : > { %v3997_v62 = vpop.f32.mrf.mxu0  ;;  %v4035_v63 = vpop.f32.mrf.mxu1 }
 0x13f   : > { %v751_v3 = vpop.f32.mrf.mxu0  ;;  %v886_v14 = vpop.f32.mrf.mxu1 }
 0x140   : > { %v4975_v16 = vadd.f32 %v886_v14, %v751_v3  ;;  %v1644_v14 = vpack.c.bf16 %v1635_v57, %v1634_v53  ;;  %v1984_v57 = vld [vmem:[#allocation2 + $0x36] sm:$0xff] }
 0x141   : > { %v3998_v51 = vpop.f32.mrf.mxu0  ;;  %v4036_v13 = vpop.f32.mrf.mxu1 }
 0x143   : > { %v983_v20 = vpop.f32.mrf.mxu0  ;;  %4216 = vmatmul.mubr.msk.bf16.gmra.mxu0 %vm448_vm0, %v4879_v1  ;;  %v1165_v21 = vpop.f32.mrf.mxu1  ;;  %4254 = vmatmul.mubr.msk.bf16.gmra.mxu1 %vm448_vm0, %v1824_v15  ;;  %v1825_v1 = vpack.c.bf16 %v1815_v34, %v1814_v39  ;;  %v1982_v34 = vld [vmem:[#allocation2 + $0x26] sm:$0xff] }
 0x144   : > { %v1054_v22 = vadd.f32 %v983_v20, %v4873_v55  ;;  %4219 = vmatprep.mubr.msk.bf16.mxu0 %vm4425_vm2, %v4424_v0  ;;  %4257 = vmatprep.mubr.msk.bf16.mxu1 %vm4425_vm2, %v4424_v0 }
 0x145   : > { %v4041_v35 = vpop.f32.mrf.mxu0  ;;  %v4079_v38 = vpop.f32.mrf.mxu1 }
 0x146   : > { %v4985_v41 = vadd.f32 %v1165_v21, %v1054_v22  ;;  %v1983_v35 = vld [vmem:[#allocation2 + $0x2e] sm:$0xff] }
 0x147   : > { %v986_v42 = vpop.f32.mrf.mxu0  ;;  %v1168_v19 = vpop.f32.mrf.mxu1 }
 0x148   : > { %v1055_v46 = vadd.f32 %v986_v42, %v4881_v2  ;;  %v1816_v2 = vld [vmem:[#allocation2 + $0xa5] sm:$0xff] }
 0x149   : > { %v4042_v47 = vpop.f32.mrf.mxu0  ;;  %v4080_v48 = vpop.f32.mrf.mxu1  ;;  %v1826_v15 = vpack.c.bf16 %v1817_v59, %v1816_v2  ;;  %v1985_v2 = vld [vmem:[#allocation2 + $0x3e] sm:$0xff] }
 0x14a   : > { %v4988_v55 = vadd.f32 %v1168_v19, %v1055_v46  ;;  %v2000_v46 = vpack.c.bf16 %v1983_v35, %v1982_v34  ;;  %v1987_v34 = vld [vmem:[#allocation2 + $0x4e] sm:$0xff] }
 0x14b   : > { %v991_v50 = vpop.f32.mrf.mxu0  ;;  %4220 = vmatmul.mubr.msk.bf16.gmra.mxu0 %vm448_vm0, %v4892_v36  ;;  %v1173_v45 = vpop.f32.mrf.mxu1  ;;  %4258 = vmatmul.mubr.msk.bf16.gmra.mxu1 %vm448_vm0, %v1825_v1 }
 0x14c   : > { %v1056_v56 = vadd.f32 %v991_v50, %v4886_v17  ;;  %4223 = vmatprep.mubr.msk.bf16.mxu0 %vm4425_vm2, %v4424_v0  ;;  %4261 = vmatprep.mubr.msk.bf16.mxu1 %vm4425_vm2, %v4424_v0 }
 0x14d   : > { %v4045_v33 = vpop.f32.mrf.mxu0  ;;  %v4083_v62 = vpop.f32.mrf.mxu1 }
 0x14e   : > { %v4998_v63 = vadd.f32 %v1173_v45, %v1056_v56 }
 0x14f   : > { %v994_v36 = vpop.f32.mrf.mxu0  ;;  %v1176_v3 = vpop.f32.mrf.mxu1 }
 0x150   : > { %v1057_v51 = vadd.f32 %v994_v36, %v4894_v37 }
 0x151   : > { %v4046_v17 = vpop.f32.mrf.mxu0  ;;  %v4084_v13 = vpop.f32.mrf.mxu1 }
 0x152   : > { %v5001_v20 = vadd.f32 %v1176_v3, %v1057_v51  ;;  %v2001_v3 = vpack.c.bf16 %v1985_v2, %v1984_v57  ;;  %v1988_v57 = vld [vmem:[#allocation2 + $0x56] sm:$0xff]  ;;  %v1989_v2 = vld [vmem:[#allocation2 + $0x5e] sm:$0xff] }
 0x153   : > { %v999_v21 = vpop.f32.mrf.mxu0  ;;  %4224 = vmatmul.mubr.msk.bf16.gmra.mxu0 %vm448_vm0, %v1644_v14  ;;  %v1181_v22 = vpop.f32.mrf.mxu1  ;;  %4262 = vmatmul.mubr.msk.bf16.gmra.mxu1 %vm448_vm0, %v1826_v15 }
 0x154   : > { %v1058_v39 = vadd.f32 %v999_v21, %v4899_v43  ;;  %4267 = vmatprep.mubr.msk.bf16.mxu0 %vm4425_vm2, %v4424_v0  ;;  %4305 = vmatprep.mubr.msk.bf16.mxu1 %vm4425_vm2, %v4424_v0 }
 0x155   : > { %v4049_v37 = vpop.f32.mrf.mxu0  ;;  %v4087_v38 = vpop.f32.mrf.mxu1 }
 0x156   : > { %v5010_v42 = vadd.f32 %v1181_v22, %v1058_v39 }
 0x157   : > { %v1002_v19 = vpop.f32.mrf.mxu0  ;;  %v1184_v1 = vpop.f32.mrf.mxu1 }
 0x158   : > { %v1059_v47 = vadd.f32 %v1002_v19, %v4908_v54 }
 0x159   : > { %v4050_v48 = vpop.f32.mrf.mxu0  ;;  %v4088_v50 = vpop.f32.mrf.mxu1 }
 0x15a   : > { %v5013_v43 = vadd.f32 %v1184_v1, %v1059_v47 }
 0x15b   : > { %v1007_v45 = vpop.f32.mrf.mxu0  ;;  %4268 = vmatmul.mubr.msk.bf16.vlgmr.msra.gmra.mxu0 %vm448_vm0, %v2000_v46  ;;  %v1189_v53 = vpop.f32.mrf.mxu1 }
 0x15c   : > { %v1060_v56 = vadd.f32 %v1007_v45, %v4914_v61  ;;  %4271 = vmatprep.mubr.msk.bf16.mxu0 %vm4425_vm2, %v4424_v0  ;;  %v2215_v61 = vld [vmem:[%s5690_s5] sm:$0xf] }
 0x15d   : > { %v4053_v59 = vpop.f32.mrf.mxu0  ;;  %v4091_v33 = vpop.f32.mrf.mxu1  ;;  %v2252_v22 = vsel %vm2250_vm3, %v2215_v61, 0 }
 0x15e   : > { %v5019_v62 = vadd.f32 %v1189_v53, %v1060_v56  ;;  %4304 = vmatpush3.bf16.msra.mxu1 %v2252_v22  ;;  %v1990_v22 = vld [vmem:[#allocation2 + $0x66] sm:$0xff] }
 0x15f   : > { %v1010_v54 = vpop.f32.mrf.mxu0  ;;  %v1192_v36 = vpop.f32.mrf.mxu1 }
 0x160   : > { %v1061_v14 = vadd.f32 %v1010_v54, %v4920_v18  ;;  %v1986_v18 = vld [vmem:[#allocation2 + $0x46] sm:$0xff] }
 0x161   : > { %v4054_v15 = vpop.f32.mrf.mxu0  ;;  %v4092_v51 = vpop.f32.mrf.mxu1  ;;  %v2002_v46 = vpack.c.bf16 %v1987_v34, %v1986_v18 }
 0x162   : > { %v5022_v17 = vadd.f32 %v1192_v36, %v1061_v14 }
 0x163   : > { %v1015_v13 = vpop.f32.mrf.mxu0  ;;  %4272 = vmatmul.mubr.msk.bf16.gmra.mxu0 %vm448_vm0, %v2001_v3  ;;  %v1197_v21 = vpop.f32.mrf.mxu1  ;;  %v2003_v3 = vpack.c.bf16 %v1989_v2, %v1988_v57 }
 0x164   : > { %v1062_v39 = vadd.f32 %v1015_v13, %v4925_v23  ;;  %4275 = vmatprep.mubr.msk.bf16.mxu0 %vm4425_vm2, %v4424_v0 }
 0x165   : > { %v4057_v35 = vpop.f32.mrf.mxu0  ;;  %v4095_v37 = vpop.f32.mrf.mxu1 }
 0x166   : > { %v5031_v38 = vadd.f32 %v1197_v21, %v1062_v39  ;;  %v1991_v39 = vld [vmem:[#allocation2 + $0x6e] sm:$0xff] }
 0x167   : > { %v1018_v19 = vpop.f32.mrf.mxu0  ;;  %v1200_v1 = vpop.f32.mrf.mxu1 }
 0x168   : > { %v1063_v47 = vadd.f32 %v1018_v19, %v4931_v44  ;;  %v2004_v19 = vpack.c.bf16 %v1991_v39, %v1990_v22 }
 0x169   : > { %v4058_v48 = vpop.f32.mrf.mxu0  ;;  %v4096_v50 = vpop.f32.mrf.mxu1 }
 0x16a   : > { %v5034_v45 = vadd.f32 %v1200_v1, %v1063_v47 }
 0x16b   : > { %v1023_v23 = vpop.f32.mrf.mxu0  ;;  %4276 = vmatmul.mubr.msk.bf16.gmra.mxu0 %vm448_vm0, %v2002_v46  ;;  %v1205_v53 = vpop.f32.mrf.mxu1 }
 0x16c   : > { %v1064_v56 = vadd.f32 %v1023_v23, %v4936_v49  ;;  %4279 = vmatprep.mubr.msk.bf16.mxu0 %vm4425_vm2, %v4424_v0 }
 0x16d   : > { %v4061_v59 = vpop.f32.mrf.mxu0  ;;  %v4099_v33 = vpop.f32.mrf.mxu1 }
 0x16e   : > { %v5040_v54 = vadd.f32 %v1205_v53, %v1064_v56  ;;  %v1992_v53 = vld [vmem:[#allocation2 + $0x76] sm:$0xff]  ;;  %v1993_v56 = vld [vmem:[#allocation2 + $0x7e] sm:$0xff] }
 0x16f   : > { %v1026_v44 = vpop.f32.mrf.mxu0  ;;  %v1208_v36 = vpop.f32.mrf.mxu1 }
 0x170   : > { %v1065_v14 = vadd.f32 %v1026_v44, %v4942_v60  ;;  %v2005_v44 = vpack.c.bf16 %v1993_v56, %v1992_v53 }
 0x171   : > { %v4062_v15 = vpop.f32.mrf.mxu0  ;;  %v4100_v51 = vpop.f32.mrf.mxu1 }
 0x172   : > { %v5043_v61 = vadd.f32 %v1208_v36, %v1065_v14 }
 0x173   : > { %v1031_v13 = vpop.f32.mrf.mxu0  ;;  %4280 = vmatmul.mubr.msk.bf16.gmra.mxu0 %vm448_vm0, %v2003_v3  ;;  %v1213_v49 = vpop.f32.mrf.mxu1 }
 0x174   : > { %v1066_v21 = vadd.f32 %v1031_v13, %v4947_v8  ;;  %4283 = vmatprep.mubr.msk.bf16.mxu0 %vm4425_vm2, %v4424_v0 }
 0x175   : > { %v4065_v18 = vpop.f32.mrf.mxu0  ;;  %v4103_v34 = vpop.f32.mrf.mxu1 }
 0x176   : > { %v5049_v35 = vadd.f32 %v1213_v49, %v1066_v21  ;;  %v1994_v49 = vld [vmem:[#allocation2 + $0x86] sm:$0xff]  ;;  %v1995_v21 = vld [vmem:[#allocation2 + $0x8e] sm:$0xff] }
 0x177   : > { %v1034_v60 = vpop.f32.mrf.mxu0  ;;  %v1216_v37 = vpop.f32.mrf.mxu1 }
 0x178   : > { %v1067_v1 = vadd.f32 %v1034_v60, %v4953_v24  ;;  %v2006_v60 = vpack.c.bf16 %v1995_v21, %v1994_v49 }
 0x179   : > { %v4066_v46 = vpop.f32.mrf.mxu0  ;;  %v4104_v47 = vpop.f32.mrf.mxu1 }
 0x17a   : > { %v5052_v48 = vadd.f32 %v1216_v37, %v1067_v1 }
 0x17b   : > { %v1039_v50 = vpop.f32.mrf.mxu0  ;;  %4284 = vmatmul.mubr.msk.bf16.gmra.mxu0 %vm448_vm0, %v2004_v19  ;;  %v1221_v8 = vpop.f32.mrf.mxu1 }
 0x17c   : > { %v1068_v23 = vadd.f32 %v1039_v50, %v4958_v40  ;;  %4287 = vmatprep.mubr.msk.bf16.mxu0 %vm4425_vm2, %v4424_v0 }
 0x17d   : > { %v4069_v57 = vpop.f32.mrf.mxu0  ;;  %v4107_v2 = vpop.f32.mrf.mxu1 }
 0x17e   : > { %v5058_v59 = vadd.f32 %v1221_v8, %v1068_v23  ;;  %v1996_v8 = vld [vmem:[#allocation2 + $0x96] sm:$0xff]  ;;  %v1997_v23 = vld [vmem:[#allocation2 + $0x9e] sm:$0xff] }
 0x17f   : > { %v1042_v24 = vpop.f32.mrf.mxu0  ;;  %v1224_v33 = vpop.f32.mrf.mxu1 }
 0x180   : > { %v1069_v36 = vadd.f32 %v1042_v24, %v4964_v52  ;;  %v2007_v24 = vpack.c.bf16 %v1997_v23, %v1996_v8 }
 0x181   : > { %v4070_v3 = vpop.f32.mrf.mxu0  ;;  %v4108_v14 = vpop.f32.mrf.mxu1 }
 0x182   : > { %v5061_v15 = vadd.f32 %v1224_v33, %v1069_v36 }
 0x183   : > { %v1047_v51 = vpop.f32.mrf.mxu0  ;;  %4288 = vmatmul.mubr.msk.bf16.gmra.mxu0 %vm448_vm0, %v2005_v44  ;;  %v1229_v40 = vpop.f32.mrf.mxu1 }
 0x184   : > { %v1070_v13 = vadd.f32 %v1047_v51, %v4969_v58  ;;  %4291 = vmatprep.mubr.msk.bf16.mxu0 %vm4425_vm2, %v4424_v0 }
 0x185   : > { %v4073_v22 = vpop.f32.mrf.mxu0  ;;  %v4111_v39 = vpop.f32.mrf.mxu1 }
 0x186   : > { %v5067_v18 = vadd.f32 %v1229_v40, %v1070_v13  ;;  %v1998_v40 = vld [vmem:[#allocation2 + $0xa6] sm:$0xff]  ;;  %v1999_v13 = vld [vmem:[#allocation2 + $0xae] sm:$0xff] }
 0x187   : > { %v1050_v52 = vpop.f32.mrf.mxu0  ;;  %v1232_v34 = vpop.f32.mrf.mxu1 }
 0x188   : > { %v1071_v37 = vadd.f32 %v1050_v52, %v4975_v16  ;;  %v2008_v52 = vpack.c.bf16 %v1999_v13, %v1998_v40 }
 0x189   : > { %v4074_v19 = vpop.f32.mrf.mxu0  ;;  %v4112_v1 = vpop.f32.mrf.mxu1 }
 0x18a   : > { %v5070_v46 = vadd.f32 %v1232_v34, %v1071_v37 }
 0x18b   : > { %v1347_v47 = vpop.f32.mrf.mxu0  ;;  %4292 = vmatmul.mubr.msk.bf16.gmra.mxu0 %vm448_vm0, %v2006_v60  ;;  %v1529_v58 = vpop.f32.mrf.mxu1 }
 0x18c   : > { %v1418_v50 = vadd.f32 %v1347_v47, %v4985_v41  ;;  %4295 = vmatprep.mubr.msk.bf16.mxu0 %vm4425_vm2, %v4424_v0 }
 0x18d   : > { %v4117_v53 = vpop.f32.mrf.mxu0  ;;  %v4155_v56 = vpop.f32.mrf.mxu1 }
 0x18e   : > { %v5076_v57 = vadd.f32 %v1529_v58, %v1418_v50 }
 0x18f   : > { %v1350_v16 = vpop.f32.mrf.mxu0  ;;  %v1532_v2 = vpop.f32.mrf.mxu1 }
 0x190   : > { %v1419_v33 = vadd.f32 %v1350_v16, %v4988_v55 }
 0x191   : > { %v4118_v44 = vpop.f32.mrf.mxu0  ;;  %v4156_v36 = vpop.f32.mrf.mxu1 }
 0x192   : > { %v5079_v3 = vadd.f32 %v1532_v2, %v1419_v33 }
 0x193   : > { %v1355_v14 = vpop.f32.mrf.mxu0  ;;  %4296 = vmatmul.mubr.msk.bf16.gmra.mxu0 %vm448_vm0, %v2007_v24  ;;  %v1537_v41 = vpop.f32.mrf.mxu1 }
 0x194   : > { %v1420_v51 = vadd.f32 %v1355_v14, %v4998_v63  ;;  %4299 = vmatprep.mubr.msk.bf16.mxu0 %vm4425_vm2, %v4424_v0 }
 0x195   : > { %v4121_v49 = vpop.f32.mrf.mxu0  ;;  %v4159_v21 = vpop.f32.mrf.mxu1 }
 0x196   : > { %v5085_v22 = vadd.f32 %v1537_v41, %v1420_v51 }
 0x197   : > { %v1358_v55 = vpop.f32.mrf.mxu0  ;;  %v1540_v39 = vpop.f32.mrf.mxu1 }
 0x198   : > { %v1421_v34 = vadd.f32 %v1358_v55, %v5001_v20 }
 0x199   : > { %v4122_v60 = vpop.f32.mrf.mxu0  ;;  %v4160_v37 = vpop.f32.mrf.mxu1 }
 0x19a   : > { %v5088_v19 = vadd.f32 %v1540_v39, %v1421_v34 }
 0x19b   : > { %v1363_v1 = vpop.f32.mrf.mxu0  ;;  %4300 = vmatmul.mubr.msk.bf16.gmra.mxu0 %vm448_vm0, %v2008_v52  ;;  %v1545_v63 = vpop.f32.mrf.mxu1 }
 0x19c   : > { %v1422_v47 = vadd.f32 %v1363_v1, %v5010_v42 }
 0x19d   : > { %v4125_v58 = vpop.f32.mrf.mxu0  ;;  %v4163_v50 = vpop.f32.mrf.mxu1 }
 0x19e   : > { %v5092_v8 = vadd.f32 %v1545_v63, %v1422_v47 }
 0x19f   : > { %v1366_v23 = vpop.f32.mrf.mxu0  ;;  %v1548_v53 = vpop.f32.mrf.mxu1 }
 0x1a0   : > { %v1423_v56 = vadd.f32 %v1366_v23, %v5013_v43 }
 0x1a1   : > { %v4126_v16 = vpop.f32.mrf.mxu0  ;;  %v4164_v20 = vpop.f32.mrf.mxu1 }
 0x1a2   : > { %v5095_v2 = vadd.f32 %v1548_v53, %v1423_v56 }
 0x1a3   : > { %v1371_v24 = vpop.f32.mrf.mxu0  ;;  %v1553_v33 = vpop.f32.mrf.mxu1 }
 0x1a4   : > { %v1424_v44 = vadd.f32 %v1371_v24, %v5019_v62 }
 0x1a5   : > { %v4129_v36 = vpop.f32.mrf.mxu0  ;;  %v4167_v14 = vpop.f32.mrf.mxu1 }
 0x1a6   : > { %v5098_v41 = vadd.f32 %v1553_v33, %v1424_v44 }
 0x1a7   : > { %v1374_v42 = vpop.f32.mrf.mxu0  ;;  %v1556_v51 = vpop.f32.mrf.mxu1 }
 0x1a8   : > { %v1425_v40 = vadd.f32 %v1374_v42, %v5022_v17 }
 0x1a9   : > { %v4130_v13 = vpop.f32.mrf.mxu0  ;;  %v4168_v49 = vpop.f32.mrf.mxu1 }
 0x1aa   : > { %v5101_v21 = vadd.f32 %v1556_v51, %v1425_v40 }
 0x1ab   : > { %v1379_v43 = vpop.f32.mrf.mxu0  ;;  %v1561_v55 = vpop.f32.mrf.mxu1 }
 0x1ac   : > { %v1426_v39 = vadd.f32 %v1379_v43, %v5031_v38 }
 0x1ad   : > { %v4133_v52 = vpop.f32.mrf.mxu0  ;;  %v4171_v34 = vpop.f32.mrf.mxu1 }
 0x1ae   : > { %v5104_v60 = vadd.f32 %v1561_v55, %v1426_v39 }
 0x1af   : > { %v1382_v62 = vpop.f32.mrf.mxu0  ;;  %v1564_v37 = vpop.f32.mrf.mxu1 }
 0x1b0   : > { %v1427_v1 = vadd.f32 %v1382_v62, %v5034_v45 }
 0x1b1   : > { %v4134_v63 = vpop.f32.mrf.mxu0  ;;  %v4172_v47 = vpop.f32.mrf.mxu1 }
 0x1b2   : > { %v5107_v58 = vadd.f32 %v1564_v37, %v1427_v1 }
 0x1b3   : > { %v1387_v17 = vpop.f32.mrf.mxu0  ;;  %v1569_v50 = vpop.f32.mrf.mxu1 }
 0x1b4   : > { %v1428_v23 = vadd.f32 %v1387_v17, %v5040_v54 }
 0x1b5   : > { %v4137_v53 = vpop.f32.mrf.mxu0  ;;  %v4175_v56 = vpop.f32.mrf.mxu1 }
 0x1b6   : > { %v5110_v16 = vadd.f32 %v1569_v50, %v1428_v23 }
 0x1b7   : > { %v1390_v38 = vpop.f32.mrf.mxu0  ;;  %v1572_v20 = vpop.f32.mrf.mxu1 }
 0x1b8   : > { %v1429_v24 = vadd.f32 %v1390_v38, %v5043_v61 }
 0x1b9   : > { %v4138_v33 = vpop.f32.mrf.mxu0  ;;  %v4176_v44 = vpop.f32.mrf.mxu1 }
 0x1ba   : > { %v5113_v36 = vadd.f32 %v1572_v20, %v1429_v24 }
 0x1bb   : > { %v1395_v45 = vpop.f32.mrf.mxu0  ;;  %v1577_v14 = vpop.f32.mrf.mxu1 }
 0x1bc   : > { %v1430_v42 = vadd.f32 %v1395_v45, %v5049_v35 }
 0x1bd   : > { %v4141_v51 = vpop.f32.mrf.mxu0  ;;  %v4179_v40 = vpop.f32.mrf.mxu1 }
 0x1be   : > { %v5116_v13 = vadd.f32 %v1577_v14, %v1430_v42 }
 0x1bf   : > { %v1398_v54 = vpop.f32.mrf.mxu0  ;;  %v1580_v49 = vpop.f32.mrf.mxu1 }
 0x1c0   : > { %v1431_v43 = vadd.f32 %v1398_v54, %v5052_v48 }
 0x1c1   : > { %v4142_v55 = vpop.f32.mrf.mxu0  ;;  %v4180_v39 = vpop.f32.mrf.mxu1 }
 0x1c2   : > { %v5119_v52 = vadd.f32 %v1580_v49, %v1431_v43 }
 0x1c3   : > { %v1403_v61 = vpop.f32.mrf.mxu0  ;;  %v1585_v34 = vpop.f32.mrf.mxu1 }
 0x1c4   : > { %v1432_v62 = vadd.f32 %v1403_v61, %v5058_v59 }
 0x1c5   : > { %v4145_v37 = vpop.f32.mrf.mxu0  ;;  %v4183_v1 = vpop.f32.mrf.mxu1 }
 0x1c6   : > { %v5122_v63 = vadd.f32 %v1585_v34, %v1432_v62 }
 0x1c7   : > { %v1406_v35 = vpop.f32.mrf.mxu0  ;;  %v1588_v47 = vpop.f32.mrf.mxu1 }
 0x1c8   : > { %v1433_v17 = vadd.f32 %v1406_v35, %v5061_v15 }
 0x1c9   : > { %v4146_v50 = vpop.f32.mrf.mxu0  ;;  %v4184_v23 = vpop.f32.mrf.mxu1 }
 0x1ca   : > { %v5125_v53 = vadd.f32 %v1588_v47, %v1433_v17 }
 0x1cb   : > { %v1411_v48 = vpop.f32.mrf.mxu0  ;;  %v1593_v56 = vpop.f32.mrf.mxu1 }
 0x1cc   : > { %v1434_v38 = vadd.f32 %v1411_v48, %v5067_v18 }
 0x1cd   : > { %v4149_v20 = vpop.f32.mrf.mxu0  ;;  %v4187_v24 = vpop.f32.mrf.mxu1 }
 0x1ce   : > { %v5128_v33 = vadd.f32 %v1593_v56, %v1434_v38 }
 0x1cf   : > { %v1414_v59 = vpop.f32.mrf.mxu0  ;;  %v1596_v44 = vpop.f32.mrf.mxu1 }
 0x1d0   : > { %v1435_v45 = vadd.f32 %v1414_v59, %v5070_v46 }
 0x1d1   : > { %v4150_v14 = vpop.f32.mrf.mxu0  ;;  %v4188_v42 = vpop.f32.mrf.mxu1 }
 0x1d2   : > { %v5131_v51 = vadd.f32 %v1596_v44, %v1435_v45 }
 0x1d3   : > { %v1711_v15 = vpop.f32.mrf.mxu0  ;;  %v1893_v40 = vpop.f32.mrf.mxu1 }
 0x1d4   : > { %v1782_v54 = vadd.f32 %v1711_v15, %v5076_v57 }
 0x1d5   : > { %v4193_v49 = vpop.f32.mrf.mxu0  ;;  %v4231_v43 = vpop.f32.mrf.mxu1 }
 0x1d6   : > { %v5134_v55 = vadd.f32 %v1893_v40, %v1782_v54 }
 0x1d7   : > { %v1714_v18 = vpop.f32.mrf.mxu0  ;;  %v1896_v39 = vpop.f32.mrf.mxu1 }
 0x1d8   : > { %v1783_v61 = vadd.f32 %v1714_v18, %v5079_v3 }
 0x1d9   : > { %v4194_v34 = vpop.f32.mrf.mxu0  ;;  %v4232_v62 = vpop.f32.mrf.mxu1 }
 0x1da   : > { %v5137_v37 = vadd.f32 %v1896_v39, %v1783_v61 }
 0x1db   : > { %v1719_v46 = vpop.f32.mrf.mxu0  ;;  %v1901_v1 = vpop.f32.mrf.mxu1 }
 0x1dc   : > { %v1784_v35 = vadd.f32 %v1719_v46, %v5085_v22 }
 0x1dd   : > { %v4197_v47 = vpop.f32.mrf.mxu0  ;;  %v4235_v17 = vpop.f32.mrf.mxu1 }
 0x1de   : > { %v5140_v50 = vadd.f32 %v1901_v1, %v1784_v35 }
 0x1df   : > { %v1722_v57 = vpop.f32.mrf.mxu0  ;;  %v1904_v23 = vpop.f32.mrf.mxu1 }
 0x1e0   : > { %v1785_v48 = vadd.f32 %v1722_v57, %v5088_v19 }
 0x1e1   : > { %v4198_v56 = vpop.f32.mrf.mxu0  ;;  %v4236_v38 = vpop.f32.mrf.mxu1 }
 0x1e2   : > { %v5143_v20 = vadd.f32 %v1904_v23, %v1785_v48 }
 0x1e3   : > { %v1727_v3 = vpop.f32.mrf.mxu0  ;;  %v1909_v24 = vpop.f32.mrf.mxu1 }
 0x1e4   : > { %v1786_v59 = vadd.f32 %v1727_v3, %v5092_v8 }
 0x1e5   : > { %v4201_v44 = vpop.f32.mrf.mxu0  ;;  %v4239_v45 = vpop.f32.mrf.mxu1 }
 0x1e6   : > { %v5146_v14 = vadd.f32 %v1909_v24, %v1786_v59 }
 0x1e7   : > { %v1730_v22 = vpop.f32.mrf.mxu0  ;;  %v1912_v42 = vpop.f32.mrf.mxu1 }
 0x1e8   : > { %v1787_v15 = vadd.f32 %v1730_v22, %v5095_v2 }
 0x1e9   : > { %v4202_v40 = vpop.f32.mrf.mxu0  ;;  %v4240_v54 = vpop.f32.mrf.mxu1 }
 0x1ea   : > { %v5149_v49 = vadd.f32 %v1912_v42, %v1787_v15 }
 0x1eb   : > { %v1735_v19 = vpop.f32.mrf.mxu0  ;;  %v1917_v43 = vpop.f32.mrf.mxu1 }
 0x1ec   : > { %v1788_v18 = vadd.f32 %v1735_v19, %v5098_v41 }
 0x1ed   : > { %v4205_v39 = vpop.f32.mrf.mxu0  ;;  %v4243_v61 = vpop.f32.mrf.mxu1 }
 0x1ee   : > { %v5152_v34 = vadd.f32 %v1917_v43, %v1788_v18 }
 0x1ef   : > { %v1738_v8 = vpop.f32.mrf.mxu0  ;;  %v1920_v62 = vpop.f32.mrf.mxu1 }
 0x1f0   : > { %v1789_v46 = vadd.f32 %v1738_v8, %v5101_v21 }
 0x1f1   : > { %v4206_v1 = vpop.f32.mrf.mxu0  ;;  %v4244_v35 = vpop.f32.mrf.mxu1 }
 0x1f2   : > { %v5155_v47 = vadd.f32 %v1920_v62, %v1789_v46 }
 0x1f3   : > { %v1743_v2 = vpop.f32.mrf.mxu0  ;;  %v1925_v17 = vpop.f32.mrf.mxu1 }
 0x1f4   : > { %v1790_v57 = vadd.f32 %v1743_v2, %v5104_v60 }
 0x1f5   : > { %v4209_v23 = vpop.f32.mrf.mxu0  ;;  %v4247_v48 = vpop.f32.mrf.mxu1 }
 0x1f6   : > { %v5158_v56 = vadd.f32 %v1925_v17, %v1790_v57 }
 0x1f7   : > { %v1746_v41 = vpop.f32.mrf.mxu0  ;;  %v1928_v38 = vpop.f32.mrf.mxu1 }
 0x1f8   : > { %v1791_v3 = vadd.f32 %v1746_v41, %v5107_v58 }
 0x1f9   : > { %v4210_v24 = vpop.f32.mrf.mxu0  ;;  %v4248_v59 = vpop.f32.mrf.mxu1 }
 0x1fa   : > { %v5161_v44 = vadd.f32 %v1928_v38, %v1791_v3 }
 0x1fb   : > { %v1751_v21 = vpop.f32.mrf.mxu0  ;;  %v1933_v45 = vpop.f32.mrf.mxu1 }
 0x1fc   : > { %v1792_v22 = vadd.f32 %v1751_v21, %v5110_v16 }
 0x1fd   : > { %v4213_v42 = vpop.f32.mrf.mxu0  ;;  %v4251_v15 = vpop.f32.mrf.mxu1 }
 0x1fe   : > { %v5164_v40 = vadd.f32 %v1933_v45, %v1792_v22  ;;  %v2166_v45 = vlaneseq }
 0x1ff   : > { %v1754_v60 = vpop.f32.mrf.mxu0  ;;  %v1936_v54 = vpop.f32.mrf.mxu1 }
 0x200   : > { %v1793_v19 = vadd.f32 %v1754_v60, %v5113_v36 }
 0x201   : > { %v4214_v43 = vpop.f32.mrf.mxu0  ;;  %v4252_v18 = vpop.f32.mrf.mxu1 }
 0x202   : > { %v5167_v39 = vadd.f32 %v1936_v54, %v1793_v19  ;;  %v5182_v19 = vshrl.u32 %v2166_v45, 7  ;;  %v2164_v18 = vld [vmem:[%s5689_s4] sm:$0x1] }
 0x203   : > { %v1759_v58 = vpop.f32.mrf.mxu0  ;;  %v1941_v61 = vpop.f32.mrf.mxu1 }
 0x204   : > { %v1794_v8 = vadd.f32 %v1759_v58, %v5116_v13 }
 0x205   : > { %v4217_v62 = vpop.f32.mrf.mxu0  ;;  %v4255_v46 = vpop.f32.mrf.mxu1 }
 0x206   : > { %v5170_v1 = vadd.f32 %v1941_v61, %v1794_v8  ;;  %v2165_v62 = vunpack.c.l.bf16 %v2164_v18  ;;  %v2168_v46 = vsub.s32 0, %v5182_v19 }
 0x207   : > { %v1762_v16 = vpop.f32.mrf.mxu0  ;;  %v1944_v35 = vpop.f32.mrf.mxu1 }
 0x208   : > { %v1795_v2 = vadd.f32 %v1762_v16, %v5119_v52 }
 0x209   : > { %v4218_v17 = vpop.f32.mrf.mxu0  ;;  %v4256_v57 = vpop.f32.mrf.mxu1 }
 0x20a   : > { %v5173_v23 = vadd.f32 %v1944_v35, %v1795_v2  ;;  %v5196_v57 = vrot.slane %v2165_v62, %v2168_v46 }
 0x20b   : > { %v1767_v36 = vpop.f32.mrf.mxu0  ;;  %v1949_v48 = vpop.f32.mrf.mxu1 }
 0x20c   : > { %v1796_v41 = vadd.f32 %v1767_v36, %v5122_v63 }
 0x20d   : > { %v4221_v38 = vpop.f32.mrf.mxu0  ;;  %v4259_v3 = vpop.f32.mrf.mxu1 }
 0x20e   : > { %v5176_v24 = vadd.f32 %v1949_v48, %v1796_v41 }
 0x20f   : > { %v1770_v13 = vpop.f32.mrf.mxu0  ;;  %v1952_v59 = vpop.f32.mrf.mxu1 }
 0x210   : > { %v1797_v21 = vadd.f32 %v1770_v13, %v5125_v53 }
 0x211   : > { %v4222_v22 = vpop.f32.mrf.mxu0  ;;  %v4260_v42 = vpop.f32.mrf.mxu1 }
 0x212   : > { %v5179_v52 = vadd.f32 %v1952_v59, %v1797_v21 }
 0x213   : > { %v1775_v15 = vpop.f32.mrf.mxu0  ;;  %v1957_v60 = vpop.f32.mrf.mxu1 }
 0x214   : > { %v1798_v54 = vadd.f32 %v1775_v15, %v5128_v33 }
 0x215   : > { %v4225_v63 = vpop.f32.mrf.mxu0  ;;  %v4263_v43 = vpop.f32.mrf.mxu1 }
 0x216   : > { %v5187_v58 = vadd.f32 %v1957_v60, %v1798_v54 }
 0x217   : > { %v1778_v53 = vpop.f32.mrf.mxu0  ;;  %v1960_v61 = vpop.f32.mrf.mxu1 }
 0x218   : > { %v1799_v8 = vadd.f32 %v1778_v53, %v5131_v51 }
 0x219   : > { %v4226_v16 = vpop.f32.mrf.mxu0  ;;  %v4264_v35 = vpop.f32.mrf.mxu1 }
 0x21a   : > { %v5191_v33 = vadd.f32 %v1960_v61, %v1799_v8 }
 0x21b   : > { %v2075_v2 = vpop.f32.mrf.mxu0 }
 0x21c   : > { %v2146_v17 = vadd.f32 %v2075_v2, %v5134_v55 }
 0x21d   : > { %v4269_v36 = vpop.f32.mrf.mxu0 }
 0x21e   : > { %v2170_v41 = vadd.f32 %v5196_v57, %v2146_v17 }
 0x21f   : > { %v2078_v48 = vpop.f32.mrf.mxu0 }
 0x220   : > { %v2147_v51 = vadd.f32 %v2078_v48, %v5137_v37  ;;  %v2188_v59 = vmax.f32 %v2170_v41, 0.0 }
 0x221   : > { %v4270_v38 = vpop.f32.mrf.mxu0 }
 0x222   : > { %v2171_v3 = vadd.f32 %v5196_v57, %v2147_v51 }
 0x223   : > { %v2083_v13 = vpop.f32.mrf.mxu0 }
 0x224   : > { %v2189_v21 = vmax.f32 %v2171_v3, 0.0  ;;  %v2148_v45 = vadd.f32 %v2083_v13, %v5140_v50 }
 0x225   : > { %v4273_v22 = vpop.f32.mrf.mxu0 }
 0x226   : > { %v2206_v55 = vpack.c.bf16 %v2189_v21, %v2188_v59  ;;  %v2172_v15 = vadd.f32 %v5196_v57, %v2148_v45 }
 0x227   : > { %v2086_v42 = vpop.f32.mrf.mxu0 }
 0x228   : > { %v2149_v60 = vadd.f32 %v2086_v42, %v5143_v20  ;;  %4306 = vmatmul.mubr.msk.bf16.vlgmr.msra.gmra.mxu1 %vm2222_vm4, %v2206_v55  ;;  %v2190_v43 = vmax.f32 %v2172_v15, 0.0 }
 0x229   : > { %v4274_v54 = vpop.f32.mrf.mxu0  ;;  %4309 = vmatprep.mubr.msk.bf16.mxu1 %vm4425_vm2, %v4424_v0 }
 0x22a   : > { %v2173_v37 = vadd.f32 %v5196_v57, %v2149_v60 }
 0x22b   : > { %v2091_v63 = vpop.f32.mrf.mxu0 }
 0x22c   : > { %v2191_v18 = vmax.f32 %v2173_v37, 0.0  ;;  %v2150_v50 = vadd.f32 %v2091_v63, %v5146_v14 }
 0x22d   : > { %v4277_v53 = vpop.f32.mrf.mxu0 }
 0x22e   : > { %v2207_v61 = vpack.c.bf16 %v2191_v18, %v2190_v43  ;;  %v2174_v62 = vadd.f32 %v5196_v57, %v2150_v50 }
 0x22f   : > { %v2094_v8 = vpop.f32.mrf.mxu0 }
 0x230   : > { %v2151_v20 = vadd.f32 %v2094_v8, %v5149_v49  ;;  %4310 = vmatmul.mubr.msk.bf16.gmra.mxu1 %vm2222_vm4, %v2207_v61  ;;  %v2192_v17 = vmax.f32 %v2174_v62, 0.0 }
 0x231   : > { %v4278_v16 = vpop.f32.mrf.mxu0  ;;  %4313 = vmatprep.mubr.msk.bf16.mxu1 %vm4425_vm2, %v4424_v0 }
 0x232   : > { %v2175_v35 = vadd.f32 %v5196_v57, %v2151_v20 }
 0x233   : > { %v2099_v2 = vpop.f32.mrf.mxu0 }
 0x234   : > { %v2193_v36 = vmax.f32 %v2175_v35, 0.0  ;;  %v2152_v14 = vadd.f32 %v2099_v2, %v5152_v34 }
 0x235   : > { %v4281_v48 = vpop.f32.mrf.mxu0 }
 0x236   : > { %v2208_v41 = vpack.c.bf16 %v2193_v36, %v2192_v17  ;;  %v2176_v38 = vadd.f32 %v5196_v57, %v2152_v14 }
 0x237   : > { %v2102_v51 = vpop.f32.mrf.mxu0 }
 0x238   : > { %v2153_v49 = vadd.f32 %v2102_v51, %v5155_v47  ;;  %4314 = vmatmul.mubr.msk.bf16.gmra.mxu1 %vm2222_vm4, %v2208_v41  ;;  %v2194_v21 = vmax.f32 %v2176_v38, 0.0 }
 0x239   : > { %v4282_v3 = vpop.f32.mrf.mxu0  ;;  %4317 = vmatprep.mubr.msk.bf16.mxu1 %vm4425_vm2, %v4424_v0 }
 0x23a   : > { %v2177_v13 = vadd.f32 %v5196_v57, %v2153_v49 }
 0x23b   : > { %v2107_v59 = vpop.f32.mrf.mxu0 }
 0x23c   : > { %v2195_v45 = vmax.f32 %v2177_v13, 0.0  ;;  %v2154_v34 = vadd.f32 %v2107_v59, %v5158_v56 }
 0x23d   : > { %v4285_v22 = vpop.f32.mrf.mxu0 }
 0x23e   : > { %v2209_v55 = vpack.c.bf16 %v2195_v45, %v2194_v21  ;;  %v2178_v15 = vadd.f32 %v5196_v57, %v2154_v34 }
 0x23f   : > { %v2110_v42 = vpop.f32.mrf.mxu0 }
 0x240   : > { %v2155_v47 = vadd.f32 %v2110_v42, %v5161_v44  ;;  %4318 = vmatmul.mubr.msk.bf16.gmra.mxu1 %vm2222_vm4, %v2209_v55  ;;  %v2196_v63 = vmax.f32 %v2178_v15, 0.0 }
 0x241   : > { %v4286_v60 = vpop.f32.mrf.mxu0  ;;  %4321 = vmatprep.mubr.msk.bf16.mxu1 %vm4425_vm2, %v4424_v0 }
 0x242   : > { %v2179_v54 = vadd.f32 %v5196_v57, %v2155_v47 }
 0x243   : > { %v2115_v37 = vpop.f32.mrf.mxu0 }
 0x244   : > { %v2197_v43 = vmax.f32 %v2179_v54, 0.0  ;;  %v2156_v56 = vadd.f32 %v2115_v37, %v5164_v40 }
 0x245   : > { %v4289_v18 = vpop.f32.mrf.mxu0 }
 0x246   : > { %v2210_v50 = vpack.c.bf16 %v2197_v43, %v2196_v63  ;;  %v2180_v61 = vadd.f32 %v5196_v57, %v2156_v56 }
 0x247   : > { %v2118_v53 = vpop.f32.mrf.mxu0 }
 0x248   : > { %v2157_v44 = vadd.f32 %v2118_v53, %v5167_v39  ;;  %4322 = vmatmul.mubr.msk.bf16.gmra.mxu1 %vm2222_vm4, %v2210_v50  ;;  %v2198_v16 = vmax.f32 %v2180_v61, 0.0 }
 0x249   : > { %v4290_v8 = vpop.f32.mrf.mxu0  ;;  %4325 = vmatprep.mubr.msk.bf16.mxu1 %vm4425_vm2, %v4424_v0 }
 0x24a   : > { %v2181_v62 = vadd.f32 %v5196_v57, %v2157_v44  ;;  %v2793_v8 = vcombine.high %v4578_v6, %v4578_v6 }
 0x24b   : > { %v2123_v20 = vpop.f32.mrf.mxu0 }
 0x24c   : > { %v2199_v35 = vmax.f32 %v2181_v62, 0.0  ;;  %v2158_v40 = vadd.f32 %v2123_v20, %v5170_v1  ;;  %v2810_v20 = vcombine.high %v4580_v7, %v4580_v7 }
 0x24d   : > { %v4293_v2 = vpop.f32.mrf.mxu0 }
 0x24e   : > { %v2211_v17 = vpack.c.bf16 %v2199_v35, %v2198_v16  ;;  %v2182_v14 = vadd.f32 %v5196_v57, %v2158_v40  ;;  %v2827_v40 = vcombine.high %v4583_v9, %v4583_v9 }
 0x24f   : > { %v2126_v36 = vpop.f32.mrf.mxu0 }
 0x250   : > { %v2159_v39 = vadd.f32 %v2126_v36, %v5173_v23  ;;  %4326 = vmatmul.mubr.msk.bf16.gmra.mxu1 %vm2222_vm4, %v2211_v17  ;;  %v2200_v38 = vmax.f32 %v2182_v14, 0.0  ;;  %v2844_v17 = vcombine.high %v4585_v10, %v4585_v10 }
 0x251   : > { %v4294_v48 = vpop.f32.mrf.mxu0  ;;  %4329 = vmatprep.mubr.msk.bf16.mxu1 %vm4425_vm2, %v4424_v0 }
 0x252   : > { %v2183_v41 = vadd.f32 %v5196_v57, %v2159_v39 }
 0x253   : > { %v2131_v51 = vpop.f32.mrf.mxu0 }
 0x254   : > { %v2201_v49 = vmax.f32 %v2183_v41, 0.0  ;;  %v2160_v1 = vadd.f32 %v2131_v51, %v5176_v24 }
 0x255   : > { %v4297_v3 = vpop.f32.mrf.mxu0 }
 0x256   : > { %v2212_v13 = vpack.c.bf16 %v2201_v49, %v2200_v38  ;;  %v2184_v21 = vadd.f32 %v5196_v57, %v2160_v1  ;;  %v2878_v3 = vcombine.high %v4589_v12, %v4589_v12 }
 0x257   : > { %v2134_v59 = vpop.f32.mrf.mxu0 }
 0x258   : > { %v2161_v23 = vadd.f32 %v2134_v59, %v5179_v52  ;;  %4330 = vmatmul.mubr.msk.bf16.gmra.mxu1 %vm2222_vm4, %v2212_v13  ;;  %v2202_v55 = vmax.f32 %v2184_v21, 0.0 }
 0x259   : > { %v4298_v45 = vpop.f32.mrf.mxu0  ;;  %4333 = vmatprep.mubr.msk.bf16.mxu1 %vm4425_vm2, %v4424_v0 }
 0x25a   : > { %v2185_v34 = vadd.f32 %v5196_v57, %v2161_v23 }
 0x25b   : > { %v2139_v22 = vpop.f32.mrf.mxu0 }
 0x25c   : > { %v2203_v42 = vmax.f32 %v2185_v34, 0.0  ;;  %v2162_v24 = vadd.f32 %v2139_v22, %v5187_v58  ;;  %v4426_v58 = vmov 1983009808   ;;  %v2895_v22 = vcombine.high %v4611_v25, %v4611_v25 }
 0x25d   : > { %v4301_v15 = vpop.f32.mrf.mxu0  ;;  %v2379_v50 = vunpack.c.l.s4 %v4426_v58 }
 0x25e   : > { %v2213_v47 = vpack.c.bf16 %v2203_v42, %v2202_v55  ;;  %v2186_v60 = vadd.f32 %v5196_v57, %v2162_v24 }
 0x25f   : > { %v2142_v54 = vpop.f32.mrf.mxu0  ;;  %v2380_v53 = vunpack.c.0.s8 %v2379_v50 }
 0x260   : > { %v2163_v52 = vadd.f32 %v2142_v54, %v5191_v33  ;;  %4334 = vmatmul.mubr.msk.bf16.gmra.mxu1 %vm2222_vm4, %v2213_v47  ;;  %v2204_v43 = vmax.f32 %v2186_v60, 0.0  ;;  %v2216_v33 = vld [vmem:[%s5691_s6] sm:$0x1] }
 0x261   : > { %v4302_v37 = vpop.f32.mrf.mxu0  ;;  %4337 = vmatprep.mubr.msk.bf16.mxu1 %vm4425_vm2, %v4424_v0  ;;  %v5259_v61 = vsub.s32 %v2380_v53, %v5182_v19  ;;  %v2759_v0 = vcombine.high %v4574_v4, %v4574_v4  ;;  %v2217_v44 = vunpack.c.l.bf16 %v2216_v33  ;;  %v2861_v19 = vcombine.high %v4587_v11, %v4587_v11 }
 0x262   : > { %v2187_v63 = vadd.f32 %v5196_v57, %v2163_v52  ;;  %v2776_v57 = vcombine.high %v4576_v5, %v4576_v5  ;;  %v2912_v53 = vcombine.high %v4613_v26, %v4613_v26 }
 0x263   : > { %v2766_v62 = vrot.slane %v4574_v4, %v5259_v61  ;;  %v2773_v16 = vrot.slane %v2759_v0, %v5259_v61  ;;  %v5277_v35 = vrot.slane %v4576_v5, %v5259_v61  ;;  %v5288_v4 = vrot.slane %v2217_v44, %v2168_v46 }
 0x264   : > { %v2205_v56 = vmax.f32 %v2187_v63, 0.0  ;;  %v5282_v2 = vrot.slane %v2776_v57, %v5259_v61  ;;  %v5292_v36 = vrot.slane %v4578_v6, %v5259_v61  ;;  %v5295_v5 = vrot.slane %v2793_v8, %v5259_v61 }
 0x265   : > { %v2774_v14 = vcombine.high %v2766_v62, %v2766_v62  ;;  %v5299_v39 = vrot.slane %v4580_v7, %v5259_v61  ;;  %v5302_v48 = vrot.slane %v2810_v20, %v5259_v61  ;;  %v2775_v46 = vcombine.high %v2773_v16, %v2773_v16 }
 0x266   : > { %v2214_v18 = vpack.c.bf16 %v2205_v56, %v2204_v43  ;;  %v2791_v41 = vcombine.high %v5277_v35, %v5277_v35  ;;  %v5310_v6 = vrot.slane %v4583_v9, %v5259_v61  ;;  %v5313_v51 = vrot.slane %v2827_v40, %v5259_v61 }
 0x267   : > { %v2792_v7 = vcombine.high %v5282_v2, %v5282_v2  ;;  %v5319_v49 = vrot.slane %v4585_v10, %v5259_v61  ;;  %v5322_v1 = vrot.slane %v2844_v17, %v5259_v61  ;;  %v2808_v13 = vcombine.high %v5292_v36, %v5292_v36 }
 0x268   : > { %4338 = vmatmul.mubr.msk.bf16.gmra.mxu1 %vm2222_vm4, %v2214_v18  ;;  %v2809_v59 = vcombine.high %v5295_v5, %v5295_v5  ;;  %v5333_v21 = vrot.slane %v4587_v11, %v5259_v61  ;;  %v2825_v23 = vcombine.high %v5299_v39, %v5299_v39  ;;  %v2826_v45 = vcombine.high %v5302_v48, %v5302_v48 }
 0x269   : > { %v5340_v34 = vrot.slane %v2861_v19, %v5259_v61  ;;  %v2842_v11 = vcombine.high %v5310_v6, %v5310_v6  ;;  %v2843_v24 = vcombine.high %v5313_v51, %v5313_v51  ;;  %v2859_v47 = vcombine.high %v5319_v49, %v5319_v49 }
 0x26a   : > { %v2860_v60 = vcombine.high %v5322_v1, %v5322_v1  ;;  %v5355_v54 = vrot.slane %v4589_v12, %v5259_v61  ;;  %v5358_v52 = vrot.slane %v2878_v3, %v5259_v61  ;;  %v2876_v56 = vcombine.high %v5333_v21, %v5333_v21 }
 0x26b   : > { %v2877_v58 = vcombine.high %v5340_v34, %v5340_v34  ;;  %v5368_v50 = vrot.slane %v4611_v25, %v5259_v61  ;;  %v5371_v12 = vrot.slane %v2895_v22, %v5259_v61  ;;  %v5388_v22 = vrot.slane %v4613_v26, %v5259_v61 }
 0x26c   : > { %v2893_v17 = vcombine.high %v5355_v54, %v5355_v54  ;;  %v2894_v25 = vcombine.high %v5358_v52, %v5358_v52 }
 0x2e8   : > { %v2288_v38 = vpop.f32.mrf.mxu1 }
 0x2e9   : > { %v2289_v9 = vadd.f32 %v2288_v38, %v5288_v4 }
 0x2ea   : > { %v4307_v10 = vpop.f32.mrf.mxu1 }
 0x2eb   : > { %v2377_v55 = vcombine.high %v2289_v9, %v2289_v9  ;;  %v2384_v42 = vrot.slane %v2289_v9, %v5259_v61 }
 0x2ec   : > { %v2291_v15 = vpop.f32.mrf.mxu1 }
 0x2ed   : > { %v2391_v37 = vrot.slane %v2377_v55, %v5259_v61  ;;  %v2392_v63 = vcombine.high %v2384_v42, %v2384_v42  ;;  %v2292_v43 = vadd.f32 %v2291_v15, %v5288_v4  ;;  %v3095_v0 = vadd.f32 %v2766_v62, %v2384_v42 }
 0x2ee   : > { %v4308_v18 = vpop.f32.mrf.mxu1  ;;  %v5392_v15 = vrot.slane %v2912_v53, %v5259_v61 }
 0x2ef   : > { %v2393_v33 = vcombine.high %v2391_v37, %v2391_v37  ;;  %v3096_v57 = vadd.f32 %v2774_v14, %v2392_v63  ;;  %v2394_v44 = vcombine.high %v2292_v43, %v2292_v43  ;;  %v3097_v8 = vadd.f32 %v2773_v16, %v2391_v37 }
 0x2f0   : > { %v2401_v20 = vrot.slane %v2292_v43, %v5259_v61  ;;  %v2296_v40 = vpop.f32.mrf.mxu1  ;;  %v2910_v16 = vcombine.high %v5368_v50, %v5368_v50  ;;  %v2911_v14 = vcombine.high %v5371_v12, %v5371_v12 }
 0x2f1   : > { %v3098_v19 = vadd.f32 %v2775_v46, %v2393_v33  ;;  %v3223_v38 = vcombine.low %v3095_v0, %v3096_v57  ;;  %v2408_v3 = vrot.slane %v2394_v44, %v5259_v61  ;;  %v2297_v9 = vadd.f32 %v2296_v40, %v5288_v4 }
 0x2f2   : > { %v2409_v10 = vcombine.high %v2401_v20, %v2401_v20  ;;  %v4311_v62 = vpop.f32.mrf.mxu1  ;;  %v3099_v46 = vadd.f32 %v5277_v35, %v2401_v20 }
 0x2f3   : > { %v3224_v55 = vcombine.low %v3097_v8, %v3098_v19  ;;  %v2410_v42 = vcombine.high %v2408_v3, %v2408_v3  ;;  %v3231_v37 = vrot.slane %v3223_v38, %v5259_v61  ;;  %v2411_v43 = vcombine.high %v2297_v9, %v2297_v9 }
 0x2f4   : > { %v3100_v63 = vadd.f32 %v2791_v41, %v2409_v10  ;;  %v2418_v18 = vrot.slane %v2297_v9, %v5259_v61  ;;  %v2299_v33 = vpop.f32.mrf.mxu1  ;;  %v3101_v57 = vadd.f32 %v5282_v2, %v2408_v3  ;;  %v5402_v41 = vrot.slane %v4615_v27, %v5259_v61 }
 0x2f5   : > { %v3238_v0 = vrot.slane %v3224_v55, %v5259_v61  ;;  %v3102_v26 = vadd.f32 %v2792_v7, %v2410_v42  ;;  %v2300_v44 = vadd.f32 %v2299_v33, %v5288_v4  ;;  %v2425_v35 = vrot.slane %v2411_v43, %v5259_v61 }
 0x2f6   : > { %v3240_v8 = vcombine.low %v3099_v46, %v3100_v63  ;;  %v2426_v53 = vcombine.high %v2418_v18, %v2418_v18  ;;  %v4312_v20 = vpop.f32.mrf.mxu1 }
 0x2f7   : > { %v3239_v40 = vcombine.low %v3231_v37, %v3238_v0  ;;  %v3241_v19 = vcombine.low %v3101_v57, %v3102_v26  ;;  %v2428_v38 = vcombine.high %v2300_v44, %v2300_v44  ;;  %v2435_v9 = vrot.slane %v2300_v44, %v5259_v61 }
 0x2f8   : > { %v3248_v2 = vrot.slane %v3240_v8, %v5259_v61  ;;  %v2427_v7 = vcombine.high %v2425_v35, %v2425_v35  ;;  %v3103_v3 = vadd.f32 %v5292_v36, %v2426_v53  ;;  %v3104_v10 = vadd.f32 %v2808_v13, %v2425_v35  ;;  %v2304_v62 = vpop.f32.mrf.mxu1 }
 0x2f9   : > { %3511 = vst.msk [vmem:[%s4600_s8] sm:$0xff] %vm448_vm0, %v3239_v40  ;;  %v3255_v55 = vrot.slane %v3241_v19, %v5259_v61  ;;  %v2442_v42 = vrot.slane %v2428_v38, %v5259_v61  ;;  %v2443_v46 = vcombine.high %v2435_v9, %v2435_v9  ;;  %v3106_v37 = vadd.f32 %v2809_v59, %v2435_v9 }
 0x2fa   : > { %v3257_v63 = vcombine.low %v3103_v3, %v3104_v10  ;;  %v3105_v43 = vadd.f32 %v5295_v5, %v2427_v7  ;;  %v2305_v18 = vadd.f32 %v2304_v62, %v5288_v4  ;;  %v4315_v36 = vpop.f32.mrf.mxu1  ;;  %v2929_v13 = vcombine.high %v4615_v27, %v4615_v27 }
 0x2fb   : > { %v3256_v33 = vcombine.low %v3248_v2, %v3255_v55  ;;  %v2444_v0 = vcombine.high %v2442_v42, %v2442_v42  ;;  %v3107_v57 = vadd.f32 %v5299_v39, %v2443_v46  ;;  %v3108_v26 = vadd.f32 %v2825_v23, %v2442_v42 }
 0x2fc   : > { %v3258_v44 = vcombine.low %v3105_v43, %v3106_v37  ;;  %v2445_v8 = vcombine.high %v2305_v18, %v2305_v18  ;;  %v2452_v59 = vrot.slane %v2305_v18, %v5259_v61  ;;  %v2307_v35 = vpop.f32.mrf.mxu1  ;;  %v2927_v5 = vcombine.high %v5388_v22, %v5388_v22 }
 0x2fd   : > { %3512 = vst.msk [vmem:[%s4600_s8 + $0x8] sm:$0xff] %vm448_vm0, %v3256_v33  ;;  %v3265_v27 = vrot.slane %v3257_v63, %v5259_v61  ;;  %v3109_v53 = vadd.f32 %v5302_v48, %v2444_v0  ;;  %v2308_v20 = vadd.f32 %v2307_v35, %v5288_v4  ;;  %v2928_v39 = vcombine.high %v5392_v15, %v5392_v15 }
 0x2fe   : > { %v3272_v23 = vrot.slane %v3258_v44, %v5259_v61  ;;  %v3274_v40 = vcombine.low %v3107_v57, %v3108_v26  ;;  %v2459_v19 = vrot.slane %v2445_v8, %v5259_v61  ;;  %v3110_v38 = vadd.f32 %v2826_v45, %v2452_v59  ;;  %v4316_v9 = vpop.f32.mrf.mxu1 }
 0x2ff   : > { %v2461_v2 = vcombine.high %v2308_v20, %v2308_v20  ;;  %v2468_v7 = vrot.slane %v2308_v20, %v5259_v61  ;;  %v2944_v3 = vcombine.high %v5402_v41, %v5402_v41  ;;  %v5444_v10 = vrot.slane %v2929_v13, %v5259_v61 }
 0x300   : > { %v3273_v62 = vcombine.low %v3265_v27, %v3272_v23  ;;  %v2460_v55 = vcombine.high %v2459_v19, %v2459_v19  ;;  %v3275_v42 = vcombine.low %v3109_v53, %v3110_v38  ;;  %v2312_v46 = vpop.f32.mrf.mxu1  ;;  %v5448_v37 = vrot.slane %v4617_v28, %v5259_v61 }
 0x301   : > { %v2475_v48 = vrot.slane %v2461_v2, %v5259_v61  ;;  %v2476_v45 = vcombine.high %v2468_v7, %v2468_v7  ;;  %v2313_v63 = vadd.f32 %v2312_v46, %v5288_v4  ;;  %v2946_v43 = vcombine.high %v4617_v28, %v4617_v28 }
 0x302   : > { %v3282_v18 = vrot.slane %v3274_v40, %v5259_v61  ;;  %3513 = vst.msk [vmem:[%s4600_s8 + $0x10] sm:$0xff] %vm448_vm0, %v3273_v62  ;;  %v3111_v36 = vadd.f32 %v5310_v6, %v2459_v19  ;;  %v3112_v13 = vadd.f32 %v2842_v11, %v2460_v55  ;;  %v3289_v33 = vrot.slane %v3275_v42, %v5259_v61  ;;  %v4319_v0 = vpop.f32.mrf.mxu1 }
 0x303   : > { %v2477_v57 = vcombine.high %v2475_v48, %v2475_v48  ;;  %v3113_v26 = vadd.f32 %v5313_v51, %v2468_v7  ;;  %v3114_v28 = vadd.f32 %v2843_v24, %v2476_v45  ;;  %v2478_v44 = vcombine.high %v2313_v63, %v2313_v63 }
 0x304   : > { %v3290_v8 = vcombine.low %v3282_v18, %v3289_v33  ;;  %v3291_v59 = vcombine.low %v3111_v36, %v3112_v13  ;;  %v3115_v35 = vadd.f32 %v5319_v49, %v2475_v48  ;;  %v2485_v27 = vrot.slane %v2313_v63, %v5259_v61  ;;  %v2315_v6 = vpop.f32.mrf.mxu1 }
 0x305   : > { %v3116_v11 = vadd.f32 %v2859_v47, %v2477_v57  ;;  %v3292_v53 = vcombine.low %v3113_v26, %v3114_v28  ;;  %v2492_v20 = vrot.slane %v2478_v44, %v5259_v61  ;;  %v2316_v23 = vadd.f32 %v2315_v6, %v5288_v4 }
 0x306   : > { %v3299_v51 = vrot.slane %v3291_v59, %v5259_v61  ;;  %3514 = vst.msk [vmem:[%s4600_s8 + $0x18] sm:$0xff] %vm448_vm0, %v3290_v8  ;;  %v2493_v24 = vcombine.high %v2485_v27, %v2485_v27  ;;  %v4320_v40 = vpop.f32.mrf.mxu1  ;;  %v2945_v19 = vcombine.high %v5444_v10, %v5444_v10  ;;  %v2961_v38 = vcombine.high %v5448_v37, %v5448_v37 }
 0x307   : > { %v3306_v49 = vrot.slane %v3292_v53, %v5259_v61  ;;  %v3308_v47 = vcombine.low %v3115_v35, %v3116_v11  ;;  %v2494_v9 = vcombine.high %v2492_v20, %v2492_v20  ;;  %v2495_v2 = vcombine.high %v2316_v23, %v2316_v23 }
 0x308   : > { %v3117_v7 = vadd.f32 %v5322_v1, %v2485_v27  ;;  %v3118_v62 = vadd.f32 %v2860_v60, %v2493_v24  ;;  %v2502_v55 = vrot.slane %v2316_v23, %v5259_v61  ;;  %v2320_v42 = vpop.f32.mrf.mxu1  ;;  %v5487_v46 = vrot.slane %v2946_v43, %v5259_v61 }
 0x309   : > { %v3307_v48 = vcombine.low %v3299_v51, %v3306_v49  ;;  %v3119_v45 = vadd.f32 %v5333_v21, %v2494_v9  ;;  %v2509_v63 = vrot.slane %v2495_v2, %v5259_v61  ;;  %v5493_v18 = vrot.slane %v4624_v29, %v5259_v61 }
 0x30a   : > { %v3309_v36 = vcombine.low %v3117_v7, %v3118_v62  ;;  %v2510_v13 = vcombine.high %v2502_v55, %v2502_v55  ;;  %v3120_v1 = vadd.f32 %v2876_v56, %v2502_v55  ;;  %v2321_v60 = vadd.f32 %v2320_v42, %v5288_v4  ;;  %v4323_v33 = vpop.f32.mrf.mxu1 }
 0x30b   : > { %v3316_v43 = vrot.slane %v3308_v47, %v5259_v61  ;;  %3515 = vst.msk [vmem:[%s4600_s8 + $0x20] sm:$0xff] %vm448_vm0, %v3307_v48  ;;  %v2511_v0 = vcombine.high %v2509_v63, %v2509_v63  ;;  %v3122_v57 = vadd.f32 %v2877_v58, %v2509_v63  ;;  %v2963_v26 = vcombine.high %v4624_v29, %v4624_v29 }
 0x30c   : > { %v3323_v28 = vrot.slane %v3309_v36, %v5259_v61  ;;  %v3121_v21 = vadd.f32 %v5340_v34, %v2510_v13  ;;  %v3325_v56 = vcombine.low %v3119_v45, %v3120_v1  ;;  %v2512_v44 = vcombine.high %v2321_v60, %v2321_v60  ;;  %v2323_v8 = vpop.f32.mrf.mxu1 }
 0x30d   : > { %v2519_v59 = vrot.slane %v2321_v60, %v5259_v61  ;;  %v3123_v35 = vadd.f32 %v5355_v54, %v2511_v0  ;;  %v2324_v27 = vadd.f32 %v2323_v8, %v5288_v4  ;;  %v2962_v58 = vcombine.high %v5487_v46, %v5487_v46 }
 0x30e   : > { %v3324_v6 = vcombine.low %v3316_v43, %v3323_v28  ;;  %v3326_v11 = vcombine.low %v3121_v21, %v3122_v57  ;;  %v2526_v29 = vrot.slane %v2512_v44, %v5259_v61  ;;  %v4324_v53 = vpop.f32.mrf.mxu1  ;;  %v2978_v34 = vcombine.high %v5493_v18, %v5493_v18 }
 0x30f   : > { %v2527_v20 = vcombine.high %v2519_v59, %v2519_v59  ;;  %v3124_v23 = vadd.f32 %v2893_v17, %v2519_v59  ;;  %v2528_v51 = vcombine.high %v2324_v27, %v2324_v27  ;;  %v2535_v24 = vrot.slane %v2324_v27, %v5259_v61 }
 0x310   : > { %3516 = vst.msk [vmem:[%s4600_s8 + $0x28] sm:$0xff] %vm448_vm0, %v3324_v6  ;;  %v3333_v40 = vrot.slane %v3325_v56, %v5259_v61  ;;  %v3340_v49 = vrot.slane %v3326_v11, %v5259_v61  ;;  %v3126_v47 = vadd.f32 %v2894_v25, %v2526_v29  ;;  %v2328_v9 = vpop.f32.mrf.mxu1  ;;  %v5529_v2 = vrot.slane %v2963_v26, %v5259_v61 }
 0x311   : > { %v3125_v54 = vadd.f32 %v5358_v52, %v2527_v20  ;;  %v3342_v17 = vcombine.low %v3123_v35, %v3124_v23  ;;  %v2542_v7 = vrot.slane %v2528_v51, %v5259_v61  ;;  %v2543_v62 = vcombine.high %v2535_v24, %v2535_v24 }
 0x312   : > { %v3341_v55 = vcombine.low %v3333_v40, %v3340_v49  ;;  %v2329_v42 = vadd.f32 %v2328_v9, %v5288_v4  ;;  %v4327_v48 = vpop.f32.mrf.mxu1  ;;  %v5536_v45 = vrot.slane %v4626_v30, %v5259_v61  ;;  %v2980_v25 = vcombine.high %v4626_v30, %v4626_v30 }
 0x313   : > { %v3343_v63 = vcombine.low %v3125_v54, %v3126_v47  ;;  %v2544_v36 = vcombine.high %v2542_v7, %v2542_v7  ;;  %v3127_v13 = vadd.f32 %v5368_v50, %v2535_v24  ;;  %v3128_v52 = vadd.f32 %v2910_v16, %v2543_v62 }
 0x314   : > { %3517 = vst.msk [vmem:[%s4600_s8 + $0x30] sm:$0xff] %vm448_vm0, %v3341_v55  ;;  %v3350_v1 = vrot.slane %v3342_v17, %v5259_v61  ;;  %v3129_v60 = vadd.f32 %v5371_v12, %v2542_v7  ;;  %v2545_v33 = vcombine.high %v2329_v42, %v2329_v42  ;;  %v2552_v43 = vrot.slane %v2329_v42, %v5259_v61  ;;  %v2331_v0 = vpop.f32.mrf.mxu1 }
 0x315   : > { %v3357_v30 = vrot.slane %v3343_v63, %v5259_v61  ;;  %v3130_v57 = vadd.f32 %v2911_v14, %v2544_v36  ;;  %v3359_v26 = vcombine.low %v3127_v13, %v3128_v52  ;;  %v2332_v50 = vadd.f32 %v2331_v0, %v5288_v4 }
 0x316   : > { %v2559_v16 = vrot.slane %v2545_v33, %v5259_v61  ;;  %v2560_v28 = vcombine.high %v2552_v43, %v2552_v43  ;;  %v4328_v21 = vpop.f32.mrf.mxu1  ;;  %v2979_v56 = vcombine.high %v5529_v2, %v5529_v2  ;;  %v2995_v44 = vcombine.high %v5536_v45, %v5536_v45 }
 0x317   : > { %v3358_v8 = vcombine.low %v3350_v1, %v3357_v30  ;;  %v3360_v59 = vcombine.low %v3129_v60, %v3130_v57  ;;  %v2562_v35 = vcombine.high %v2332_v50, %v2332_v50  ;;  %v5560_v12 = vrot.slane %v2980_v25, %v5259_v61 }
 0x318   : > { %v2561_v14 = vcombine.high %v2559_v16, %v2559_v16  ;;  %v3131_v27 = vadd.f32 %v5388_v22, %v2552_v43  ;;  %v3132_v6 = vadd.f32 %v2927_v5, %v2560_v28  ;;  %v2569_v11 = vrot.slane %v2332_v50, %v5259_v61  ;;  %v2336_v29 = vpop.f32.mrf.mxu1 }
 0x319   : > { %3518 = vst.msk [vmem:[%s4600_s8 + $0x38] sm:$0xff] %vm448_vm0, %v3358_v8  ;;  %v3367_v53 = vrot.slane %v3359_v26, %v5259_v61  ;;  %v3374_v20 = vrot.slane %v3360_v59, %v5259_v61  ;;  %v2576_v23 = vrot.slane %v2562_v35, %v5259_v61  ;;  %v2337_v51 = vadd.f32 %v2336_v29, %v5288_v4 }
 0x31a   : > { %v3133_v24 = vadd.f32 %v5392_v15, %v2559_v16  ;;  %v3134_v22 = vadd.f32 %v2928_v39, %v2561_v14  ;;  %v3376_v5 = vcombine.low %v3131_v27, %v3132_v6  ;;  %v2577_v40 = vcombine.high %v2569_v11, %v2569_v11  ;;  %v4331_v49 = vpop.f32.mrf.mxu1 }
 0x31b   : > { %v3375_v47 = vcombine.low %v3367_v53, %v3374_v20  ;;  %v2578_v9 = vcombine.high %v2576_v23, %v2576_v23  ;;  %v3136_v54 = vadd.f32 %v2944_v3, %v2576_v23  ;;  %v2579_v17 = vcombine.high %v2337_v51, %v2337_v51 }
 0x31c   : > { %v3377_v7 = vcombine.low %v3133_v24, %v3134_v22  ;;  %v3135_v62 = vadd.f32 %v5402_v41, %v2577_v40  ;;  %v2586_v55 = vrot.slane %v2337_v51, %v5259_v61  ;;  %v2339_v42 = vpop.f32.mrf.mxu1  ;;  %v2997_v15 = vcombine.high %v4628_v31, %v4628_v31 }
 0x31d   : > { %3519 = vst.msk [vmem:[%s4600_s8 + $0x40] sm:$0xff] %vm448_vm0, %v3375_v47  ;;  %v3384_v39 = vrot.slane %v3376_v5, %v5259_v61  ;;  %v2593_v48 = vrot.slane %v2579_v17, %v5259_v61  ;;  %v3137_v25 = vadd.f32 %v5444_v10, %v2578_v9  ;;  %v2340_v3 = vadd.f32 %v2339_v42, %v5288_v4 }
 0x31e   : > { %v3391_v63 = vrot.slane %v3377_v7, %v5259_v61  ;;  %v3393_v36 = vcombine.low %v3135_v62, %v3136_v54  ;;  %v2594_v41 = vcombine.high %v2586_v55, %v2586_v55  ;;  %v3138_v13 = vadd.f32 %v2945_v19, %v2586_v55  ;;  %v4332_v52 = vpop.f32.mrf.mxu1 }
 0x31f   : > { %v2595_v1 = vcombine.high %v2593_v48, %v2593_v48  ;;  %v3140_v60 = vadd.f32 %v2961_v38, %v2593_v48  ;;  %v2596_v33 = vcombine.high %v2340_v3, %v2340_v3  ;;  %v2603_v43 = vrot.slane %v2340_v3, %v5259_v61 }
 0x320   : > { %v3392_v0 = vcombine.low %v3384_v39, %v3391_v63  ;;  %v3139_v30 = vadd.f32 %v5448_v37, %v2594_v41  ;;  %v3394_v57 = vcombine.low %v3137_v25, %v3138_v13  ;;  %v2344_v26 = vpop.f32.mrf.mxu1  ;;  %v5601_v50 = vrot.slane %v4628_v31, %v5259_v61 }
 0x321   : > { %v2610_v10 = vrot.slane %v2596_v33, %v5259_v61  ;;  %v3141_v19 = vadd.f32 %v5487_v46, %v2595_v1  ;;  %v3142_v38 = vadd.f32 %v2962_v58, %v2603_v43  ;;  %v2345_v16 = vadd.f32 %v2344_v26, %v5288_v4 }
 0x322   : > { %3520 = vst.msk [vmem:[%s4600_s8 + $0x48] sm:$0xff] %vm448_vm0, %v3392_v0  ;;  %v3401_v37 = vrot.slane %v3393_v36, %v5259_v61  ;;  %v3408_v28 = vrot.slane %v3394_v57, %v5259_v61  ;;  %v3410_v21 = vcombine.low %v3139_v30, %v3140_v60  ;;  %v4335_v31 = vpop.f32.mrf.mxu1  ;;  %v3011_v8 = vrot.slane %v2997_v15, %v5259_v61 }
 0x323   : > { %v2611_v59 = vcombine.high %v2610_v10, %v2610_v10  ;;  %v3411_v35 = vcombine.low %v3141_v19, %v3142_v38  ;;  %v2612_v14 = vcombine.high %v2345_v16, %v2345_v16  ;;  %v3014_v46 = vcombine.high %v4630_v32, %v4630_v32 }
 0x324   : > { %v3409_v58 = vcombine.low %v3401_v37, %v3408_v28  ;;  %v3418_v27 = vrot.slane %v3410_v21, %v5259_v61  ;;  %v3143_v6 = vadd.f32 %v5493_v18, %v2610_v10  ;;  %v2619_v11 = vrot.slane %v2345_v16, %v5259_v61  ;;  %v2347_v29 = vpop.f32.mrf.mxu1 }
 0x325   : > { %v3144_v53 = vadd.f32 %v2978_v34, %v2611_v59  ;;  %v3425_v20 = vrot.slane %v3411_v35, %v5259_v61  ;;  %v2626_v23 = vrot.slane %v2612_v14, %v5259_v61  ;;  %v2348_v51 = vadd.f32 %v2347_v29, %v5288_v4 }
 0x326   : > { %3521 = vst.msk [vmem:[%s4600_s8 + $0x50] sm:$0xff] %vm448_vm0, %v3409_v58  ;;  %v2627_v24 = vcombine.high %v2619_v11, %v2619_v11  ;;  %v2996_v22 = vcombine.high %v5560_v12, %v5560_v12  ;;  %v4336_v5 = vpop.f32.mrf.mxu1  ;;  %v3012_v40 = vcombine.high %v5601_v50, %v5601_v50  ;;  %v3021_v18 = vrot.slane %v4630_v32, %v5259_v61 }
 0x327   : > { %v3426_v34 = vcombine.low %v3418_v27, %v3425_v20  ;;  %v3427_v49 = vcombine.low %v3143_v6, %v3144_v53  ;;  %v2628_v47 = vcombine.high %v2626_v23, %v2626_v23  ;;  %v3013_v9 = vcombine.high %v3011_v8, %v3011_v8 }
 0x328   : > { %v3145_v54 = vadd.f32 %v5529_v2, %v2619_v11  ;;  %v3146_v17 = vadd.f32 %v2979_v56, %v2627_v24  ;;  %v2629_v7 = vcombine.high %v2348_v51, %v2348_v51  ;;  %v2636_v62 = vrot.slane %v2348_v51, %v5259_v61  ;;  %v2352_v55 = vpop.f32.mrf.mxu1 }
 0x329   : > { %3522 = vst.msk [vmem:[%s4600_s8 + $0x58] sm:$0xff] %vm448_vm0, %v3426_v34  ;;  %v3147_v42 = vadd.f32 %v5536_v45, %v2626_v23  ;;  %v3148_v32 = vadd.f32 %v2995_v44, %v2628_v47  ;;  %v2353_v15 = vadd.f32 %v2352_v55, %v5288_v4  ;;  %v3028_v39 = vrot.slane %v3014_v46, %v5259_v61 }
 0x32a   : > { %v3428_v48 = vcombine.low %v3145_v54, %v3146_v17  ;;  %v2643_v2 = vrot.slane %v2629_v7, %v5259_v61  ;;  %v2644_v56 = vcombine.high %v2636_v62, %v2636_v62  ;;  %v4339_v25 = vpop.f32.mrf.mxu1  ;;  %v3029_v3 = vcombine.high %v3021_v18, %v3021_v18 }
 0x32b   : > { %v3435_v63 = vrot.slane %v3427_v49, %v5259_v61  ;;  %v3444_v36 = vcombine.low %v3147_v42, %v3148_v32  ;;  %v2646_v41 = vcombine.high %v2353_v15, %v2353_v15  ;;  %v2653_v13 = vrot.slane %v2353_v15, %v5259_v61 }
 0x32c   : > { %v3442_v52 = vrot.slane %v3428_v48, %v5259_v61  ;;  %v2645_v45 = vcombine.high %v2643_v2, %v2643_v2  ;;  %v3149_v44 = vadd.f32 %v5560_v12, %v2636_v62  ;;  %v3150_v1 = vadd.f32 %v2996_v22, %v2644_v56  ;;  %v2355_v60 = vpop.f32.mrf.mxu1 }
 0x32d   : > { %v2660_v33 = vrot.slane %v2646_v41, %v5259_v61  ;;  %v2661_v43 = vcombine.high %v2653_v13, %v2653_v13  ;;  %v3152_v0 = vadd.f32 %v3012_v40, %v2653_v13  ;;  %v3030_v30 = vcombine.high %v3028_v39, %v3028_v39 }
 0x32e   : > { %v3443_v57 = vcombine.low %v3435_v63, %v3442_v52  ;;  %v3151_v26 = vadd.f32 %v5601_v50, %v2645_v45  ;;  %v3445_v10 = vcombine.low %v3149_v44, %v3150_v1  ;;  %v2356_v19 = vadd.f32 %v2355_v60, %v5288_v4  ;;  %v4340_v38 = vpop.f32.mrf.mxu1 }
 0x32f   : > { %v3452_v16 = vrot.slane %v3444_v36, %v5259_v61  ;;  %v2662_v37 = vcombine.high %v2660_v33, %v2660_v33  ;;  %v3153_v12 = vadd.f32 %v3011_v8, %v2661_v43  ;;  %v3154_v28 = vadd.f32 %v3013_v9, %v2660_v33 }
 0x330   : > { %3523 = vst.msk [vmem:[%s4600_s8 + $0x60] sm:$0xff] %vm448_vm0, %v3443_v57  ;;  %v3459_v21 = vrot.slane %v3445_v10, %v5259_v61  ;;  %v3461_v31 = vcombine.low %v3151_v26, %v3152_v0  ;;  %v2663_v59 = vcombine.high %v2356_v19, %v2356_v19  ;;  %v2670_v35 = vrot.slane %v2356_v19, %v5259_v61 }
 0x331   : > { %v3462_v50 = vcombine.low %v3153_v12, %v3154_v28  ;;  %v3155_v14 = vadd.f32 %v3021_v18, %v2662_v37 }
 0x332   : > { %v3460_v46 = vcombine.low %v3452_v16, %v3459_v21  ;;  %v2677_v4 = vrot.slane %v2663_v59, %v5259_v61  ;;  %v2678_v58 = vcombine.high %v2670_v35, %v2670_v35  ;;  %v3469_v27 = vrot.slane %v3461_v31, %v5259_v61 }
 0x333   : > { %v3476_v8 = vrot.slane %v3462_v50, %v5259_v61  ;;  %v3156_v6 = vadd.f32 %v3029_v3, %v2670_v35 }
 0x334   : > { %3524 = vst.msk [vmem:[%s4600_s8 + $0x68] sm:$0xff] %vm448_vm0, %v3460_v46  ;;  %v3157_v11 = vadd.f32 %v3028_v39, %v2678_v58  ;;  %v3158_v29 = vadd.f32 %v3030_v30, %v2677_v4 }
 0x335   : > { %v3477_v53 = vcombine.low %v3469_v27, %v3476_v8  ;;  %v3478_v20 = vcombine.low %v3155_v14, %v3156_v6 }
 0x336   : > { %v3479_v23 = vcombine.low %v3157_v11, %v3158_v29 }
 0x337   : > { %3525 = vst.msk [vmem:[%s4600_s8 + $0x70] sm:$0xff] %vm448_vm0, %v3477_v53  ;;  %v3486_v51 = vrot.slane %v3478_v20, %v5259_v61 }
 0x338   : > { %v3493_v24 = vrot.slane %v3479_v23, %v5259_v61 }
 0x33a   : > { %v3494_v22 = vcombine.low %v3486_v51, %v3493_v24 }
 0x33c   : > { %3526 = vst.msk [vmem:[%s4600_s8 + $0x78] sm:$0xff] %vm448_vm0, %v3494_v22 }
 0x33d PF: > { %s17_s28 = sadd.s32 1, %s4422_s28   ;;  %s5694_s24 = smov %s4414_s26 }
 0x33e   : > { %p14_p12 = scmp.ge.s32.totalorder %s17_s28, 6   ;;  %s5695_s25 = smov %s4418_s27 }
 0x33f   : > { %s5696_s26 = smov %s5699_s29  ;;  %s5697_s27 = smov %s5703_s30 }
 0x340   :  { %16 = sbr.rel (!%p14_p12) target bundleno = 3 (0x3), region = 100 }

</bundles_post_ra>
